<compile_context>
chip_gen: v7x
topology: tpu7x:2x2x1
jax: 0.10.0
libtpu: 0.0.40
codegen_flags: <defaults>
</compile_context>

<pallas_src>
import jax
import jax.numpy as jnp
from jax.experimental import pallas as pl
from jax.experimental.pallas import tpu as pltpu


def _tucker_kernel(idx_ref, u2_ref, *refs):
    """One batch tile of the Tucker contraction, batch on the lane axis.

    idx_ref : (D, BT)  int32   row of Qs[k] to use for sample j  = idx_ref[k, j]
    u2_ref  : (R^{D-1}, R)     Tucker core, last axis kept separate
    refs    : (QsT_0, ..., QsT_{D-1}, out)
        QsT_k : (R, shape[k])  factor k, transposed, fully resident in VMEM
        out   : (1, BT)        lane-dense output block
    """
    out_ref = refs[-1]
    q_refs = refs[:-1]
    D = len(q_refs)
    R = u2_ref.shape[1]
    BT = out_ref.shape[1]

    idx = idx_ref[...]                                   # (D, BT) int32
    U2 = u2_ref[...]                                     # (R^{D-1}, R) f32

    # ---- fused gather: qT[k][r, j] = Qs[k][idx[k, j], r]  (one-hot @ Qs) ----
    # Exactly one 1 per column, so the matmul reproduces the gathered row.
    qT = []
    for k in range(D):
        QkT = q_refs[k][...]                             # (R, S_k)
        Sk = QkT.shape[1]
        onehot = jnp.where(
            jax.lax.broadcasted_iota(jnp.int32, (Sk, BT), 0) == idx[k:k + 1, :],
            1.0, 0.0)                                    # (S_k, BT) f32
        qT.append(jax.lax.dot_general(
            QkT, onehot, (((1,), (0,)), ((), ())),
            preferred_element_type=jnp.float32))         # (R, BT)

    # ---- contract core axis a_{D-1}: unrolled R-step VPU FMA, lane-dense ----
    # res[m, j] = sum_i U2[m, i] * qT[D-1][i, j],  m = flat (a_0 .. a_{D-2})
    q_last = qT[D - 1]
    res = U2[:, 0:1] * q_last[0:1, :]
    for i in range(1, R):
        res = res + U2[:, i:i + 1] * q_last[i:i + 1, :]  # (R^{D-1}, BT)
    # NOTE: for large R/D, tile this R^{D-1} axis with a fori_loop instead of
    # materializing the full (R^{D-1}, BT) intermediate (VMEM/vreg pressure).

    # ---- contract remaining axes a_0 .. a_{D-2}: leading-block VPU FMAs ----
    # Before step k, res's leading flat index encodes (a_k, ..., a_{D-2}).
    for k in range(D - 1):
        blk = R ** (D - 2 - k)
        qk = qT[k]
        acc = res[0:blk, :] * qk[0:1, :]
        for a in range(1, R):
            acc = acc + res[a * blk:(a + 1) * blk, :] * qk[a:a + 1, :]
        res = acc                                        # (R^{D-2-k}, BT)

    out_ref[...] = res                                   # (1, BT)


def tucker_forward(x, U, Qs, shape, *, block_b=512):
    """Pallas implementation of ModelConTucker.forward (interpolation='closest')."""
    B, D = x.shape
    assert D == len(shape) and D >= 2
    R = U.shape[-1]
    assert block_b % 128 == 0, "batch tile must be lane-aligned (multiple of 128)"

    # --- reference clipping: each column of x clipped with its own bound ---
    cols = [jnp.clip(x[:, c], 0.0, float(shape[c] - 1)) for c in range(D)]

    # Column of idx used for Qs[k] (quirk of the reference contract()).
    col_for_q = [0] * D
    col_for_q[D - 1] = D - 1
    for k in range(1, D - 1):
        col_for_q[k] = D - 2 - k

    # gidx[k, j] = row of Qs[k] used by sample j.  The second clip reproduces
    # the gather clamping jnp applies when the reference's cross-column quirk
    # would index past Qs[k]'s first dim (same behaviour as the previous kernel,
    # intentional fidelity to the reference; float->int truncation == .long()).
    gidx = jnp.stack(
        [jnp.clip(cols[col_for_q[k]], 0.0, float(shape[k] - 1)).astype(jnp.int32)
         for k in range(D)], axis=0)                     # (D, B) int32

    # Pad the batch so any B works; padded samples use (valid) index 0 and are
    # dropped on the way out.
    nb = (B + block_b - 1) // block_b
    B_pad = nb * block_b
    if B_pad != B:
        gidx = jnp.pad(gidx, ((0, 0), (0, B_pad - B)))

    # Pre-reshape / pre-transpose the parameters once in the wrapper (free
    # layout plumbing; avoids in-kernel relayouts).
    U2 = U.reshape(R ** (D - 1), R)
    QsT = [Qs[k].T for k in range(D)]                    # (R, shape[k]) each

    in_specs = [pl.BlockSpec((D, block_b), lambda i: (0, i))]   # indices, per tile
    # Core + factors: constant index_map -> fetched once, resident in VMEM.
    # (If R/D grow, add pipeline_mode=pl.Buffered(1) here to drop the second
    #  pipeline buffer for these constant blocks.)
    in_specs += [pl.BlockSpec(U2.shape, lambda i: (0, 0))]
    in_specs += [pl.BlockSpec(QsT[k].shape, lambda i: (0, 0)) for k in range(D)]

    out = pl.pallas_call(
        _tucker_kernel,
        grid=(nb,),
        in_specs=in_specs,
        out_specs=pl.BlockSpec((1, block_b), lambda i: (0, i)),   # lane-dense
        out_shape=jax.ShapeDtypeStruct((1, B_pad), jnp.float32),
        compiler_params=pltpu.CompilerParams(dimension_semantics=("parallel",)),
    )(gidx, U2, *QsT)
    return out[0, :B]


def tucker_forward_ref(x, U, Qs, shape):
    """Pure-JAX transliteration of the PyTorch forward, for correctness check."""
    B, D = x.shape
    cols = [jnp.clip(x[:, i], 0.0, float(shape[i] - 1)) for i in range(D)]
    idx = jnp.stack(cols, axis=1).astype(jnp.int32)
    hi = jax.lax.Precision.HIGHEST
    res = jnp.einsum('...i,ji->j...', U, Qs[-1][idx[:, -1]], precision=hi)
    for i, Q in enumerate(Qs[1:-1][::-1]):
        res = jnp.einsum('j...i,ji->j...', res, Q[idx[:, i]], precision=hi)
    res = jnp.einsum('ji,ji->j', res, Qs[0][idx[:, 0]], precision=hi)
    return res


if __name__ == "__main__":
    key = jax.random.PRNGKey(0)

    # Module config (small): 3-mode tensor, rank 8.
    shape = (16, 12, 20)
    rank_max = 8
    D = len(shape)
    B = 1000   # not a multiple of the batch tile -> exercises padding; grid = 2

    k_u, k_q, k_x = jax.random.split(key, 3)
    # Deterministic "torch.rand"-style uniform [0, 1) parameters.
    U = jax.random.uniform(k_u, (rank_max,) * D, dtype=jnp.float32)
    q_keys = jax.random.split(k_q, D)
    Qs = [jax.random.uniform(q_keys[i], (shape[i], rank_max), dtype=jnp.float32)
          for i in range(D)]

    # x carries per-mode indices (floats), including out-of-range values so the
    # clipping path is exercised.
    x = jax.random.uniform(k_x, (B, D), dtype=jnp.float32,
                           minval=-2.0, maxval=float(max(shape)) + 3.0)

    out = tucker_forward(x, U, Qs, shape, block_b=512)
    out = jax.block_until_ready(out)

    ref = tucker_forward_ref(x, U, Qs, shape)
    assert out.shape == (B,)
    assert jnp.allclose(out, ref, rtol=1e-5, atol=1e-4), (out, ref)
    print("KERNEL_OK")
</pallas_src>

<mosaic_0001>
module attributes {stable_mosaic.version = 11 : i64} {
  func.func @_tucker_kernel(%arg0: i32, %arg1: memref<3x512xi32, #tpu.memory_space<vmem>>, %arg2: memref<64x8xf32, #tpu.memory_space<vmem>>, %arg3: memref<8x16xf32, #tpu.memory_space<vmem>>, %arg4: memref<8x12xf32, #tpu.memory_space<vmem>>, %arg5: memref<8x20xf32, #tpu.memory_space<vmem>>, %arg6: memref<1x512xf32, #tpu.memory_space<vmem>>) attributes {dimension_semantics = [#tpu.dimension_semantics<parallel>], iteration_bounds = array<i64: 2>, scalar_prefetch = 0 : i64, scratch_operands = 0 : i64, tpu.core_type = #tpu.core_type<tc>, window_params = [{transform_indices = @transform_0, window_bounds = array<i64: 3, 512>}, {pipeline_mode = #tpu.pipeline_mode<synchronous>, transform_indices = @transform_1, window_bounds = array<i64: 64, 8>}, {pipeline_mode = #tpu.pipeline_mode<synchronous>, transform_indices = @transform_2, window_bounds = array<i64: 8, 16>}, {pipeline_mode = #tpu.pipeline_mode<synchronous>, transform_indices = @transform_3, window_bounds = array<i64: 8, 12>}, {pipeline_mode = #tpu.pipeline_mode<synchronous>, transform_indices = @transform_4, window_bounds = array<i64: 8, 20>}, {transform_indices = @transform_5, window_bounds = array<i64: 1, 512>}]} {
    %c0 = arith.constant 0 : index
    %c0_0 = arith.constant 0 : index
    %0 = vector.load %arg1[%c0, %c0_0] : memref<3x512xi32, #tpu.memory_space<vmem>>, vector<3x512xi32>
    %c0_1 = arith.constant 0 : index
    %c0_2 = arith.constant 0 : index
    %1 = vector.load %arg2[%c0_1, %c0_2] : memref<64x8xf32, #tpu.memory_space<vmem>>, vector<64x8xf32>
    %c0_3 = arith.constant 0 : index
    %c0_4 = arith.constant 0 : index
    %2 = vector.load %arg3[%c0_3, %c0_4] : memref<8x16xf32, #tpu.memory_space<vmem>>, vector<8x16xf32>
    %3 = tpu.iota {dimensions = array<i32: 0>} : vector<16x512xi32>
    %4 = vector.extract_strided_slice %0 {offsets = [0, 0], sizes = [1, 512], strides = [1, 1]} : vector<3x512xi32> to vector<1x512xi32>
    %5 = vector.broadcast %4 : vector<1x512xi32> to vector<16x512xi32>
    %6 = arith.cmpi eq, %3, %5 : vector<16x512xi32>
    %cst = arith.constant 1.000000e+00 : f32
    %cst_5 = arith.constant 0.000000e+00 : f32
    %7 = vector.broadcast %cst : f32 to vector<16x512xf32>
    %8 = vector.broadcast %cst_5 : f32 to vector<16x512xf32>
    %9 = arith.select %6, %7, %8 : vector<16x512xi1>, vector<16x512xf32>
    %cst_6 = arith.constant dense<0.000000e+00> : vector<8x512xf32>
    %10 = tpu.matmul %2, %9, %cst_6 {dimension_numbers = #tpu.dot_dimension_numbers<[1], [0], [0], [1], [0, 0, 1, 1], [], []>} : vector<8x16xf32>, vector<16x512xf32>, vector<8x512xf32> -> vector<8x512xf32>
    %c0_7 = arith.constant 0 : index
    %c0_8 = arith.constant 0 : index
    %11 = vector.load %arg4[%c0_7, %c0_8] : memref<8x12xf32, #tpu.memory_space<vmem>>, vector<8x12xf32>
    %12 = tpu.iota {dimensions = array<i32: 0>} : vector<12x512xi32>
    %13 = vector.extract_strided_slice %0 {offsets = [1, 0], sizes = [1, 512], strides = [1, 1]} : vector<3x512xi32> to vector<1x512xi32>
    %14 = vector.broadcast %13 : vector<1x512xi32> to vector<12x512xi32>
    %15 = arith.cmpi eq, %12, %14 : vector<12x512xi32>
    %cst_9 = arith.constant 1.000000e+00 : f32
    %cst_10 = arith.constant 0.000000e+00 : f32
    %16 = vector.broadcast %cst_9 : f32 to vector<12x512xf32>
    %17 = vector.broadcast %cst_10 : f32 to vector<12x512xf32>
    %18 = arith.select %15, %16, %17 : vector<12x512xi1>, vector<12x512xf32>
    %cst_11 = arith.constant dense<0.000000e+00> : vector<8x512xf32>
    %19 = tpu.matmul %11, %18, %cst_11 {dimension_numbers = #tpu.dot_dimension_numbers<[1], [0], [0], [1], [0, 0, 1, 1], [], []>} : vector<8x12xf32>, vector<12x512xf32>, vector<8x512xf32> -> vector<8x512xf32>
    %c0_12 = arith.constant 0 : index
    %c0_13 = arith.constant 0 : index
    %20 = vector.load %arg5[%c0_12, %c0_13] : memref<8x20xf32, #tpu.memory_space<vmem>>, vector<8x20xf32>
    %21 = tpu.iota {dimensions = array<i32: 0>} : vector<20x512xi32>
    %22 = vector.extract_strided_slice %0 {offsets = [2, 0], sizes = [1, 512], strides = [1, 1]} : vector<3x512xi32> to vector<1x512xi32>
    %23 = vector.broadcast %22 : vector<1x512xi32> to vector<20x512xi32>
    %24 = arith.cmpi eq, %21, %23 : vector<20x512xi32>
    %cst_14 = arith.constant 1.000000e+00 : f32
    %cst_15 = arith.constant 0.000000e+00 : f32
    %25 = vector.broadcast %cst_14 : f32 to vector<20x512xf32>
    %26 = vector.broadcast %cst_15 : f32 to vector<20x512xf32>
    %27 = arith.select %24, %25, %26 : vector<20x512xi1>, vector<20x512xf32>
    %cst_16 = arith.constant dense<0.000000e+00> : vector<8x512xf32>
    %28 = tpu.matmul %20, %27, %cst_16 {dimension_numbers = #tpu.dot_dimension_numbers<[1], [0], [0], [1], [0, 0, 1, 1], [], []>} : vector<8x20xf32>, vector<20x512xf32>, vector<8x512xf32> -> vector<8x512xf32>
    %29 = vector.extract_strided_slice %1 {offsets = [0, 0], sizes = [64, 1], strides = [1, 1]} : vector<64x8xf32> to vector<64x1xf32>
    %30 = vector.extract_strided_slice %28 {offsets = [0, 0], sizes = [1, 512], strides = [1, 1]} : vector<8x512xf32> to vector<1x512xf32>
    %31 = vector.broadcast %29 : vector<64x1xf32> to vector<64x512xf32>
    %32 = vector.broadcast %30 : vector<1x512xf32> to vector<64x512xf32>
    %33 = arith.mulf %31, %32 : vector<64x512xf32>
    %34 = vector.extract_strided_slice %1 {offsets = [0, 1], sizes = [64, 1], strides = [1, 1]} : vector<64x8xf32> to vector<64x1xf32>
    %35 = vector.extract_strided_slice %28 {offsets = [1, 0], sizes = [1, 512], strides = [1, 1]} : vector<8x512xf32> to vector<1x512xf32>
    %36 = vector.broadcast %34 : vector<64x1xf32> to vector<64x512xf32>
    %37 = vector.broadcast %35 : vector<1x512xf32> to vector<64x512xf32>
    %38 = arith.mulf %36, %37 : vector<64x512xf32>
    %39 = arith.addf %33, %38 : vector<64x512xf32>
    %40 = vector.extract_strided_slice %1 {offsets = [0, 2], sizes = [64, 1], strides = [1, 1]} : vector<64x8xf32> to vector<64x1xf32>
    %41 = vector.extract_strided_slice %28 {offsets = [2, 0], sizes = [1, 512], strides = [1, 1]} : vector<8x512xf32> to vector<1x512xf32>
    %42 = vector.broadcast %40 : vector<64x1xf32> to vector<64x512xf32>
    %43 = vector.broadcast %41 : vector<1x512xf32> to vector<64x512xf32>
    %44 = arith.mulf %42, %43 : vector<64x512xf32>
    %45 = arith.addf %39, %44 : vector<64x512xf32>
    %46 = vector.extract_strided_slice %1 {offsets = [0, 3], sizes = [64, 1], strides = [1, 1]} : vector<64x8xf32> to vector<64x1xf32>
    %47 = vector.extract_strided_slice %28 {offsets = [3, 0], sizes = [1, 512], strides = [1, 1]} : vector<8x512xf32> to vector<1x512xf32>
    %48 = vector.broadcast %46 : vector<64x1xf32> to vector<64x512xf32>
    %49 = vector.broadcast %47 : vector<1x512xf32> to vector<64x512xf32>
    %50 = arith.mulf %48, %49 : vector<64x512xf32>
    %51 = arith.addf %45, %50 : vector<64x512xf32>
    %52 = vector.extract_strided_slice %1 {offsets = [0, 4], sizes = [64, 1], strides = [1, 1]} : vector<64x8xf32> to vector<64x1xf32>
    %53 = vector.extract_strided_slice %28 {offsets = [4, 0], sizes = [1, 512], strides = [1, 1]} : vector<8x512xf32> to vector<1x512xf32>
    %54 = vector.broadcast %52 : vector<64x1xf32> to vector<64x512xf32>
    %55 = vector.broadcast %53 : vector<1x512xf32> to vector<64x512xf32>
    %56 = arith.mulf %54, %55 : vector<64x512xf32>
    %57 = arith.addf %51, %56 : vector<64x512xf32>
    %58 = vector.extract_strided_slice %1 {offsets = [0, 5], sizes = [64, 1], strides = [1, 1]} : vector<64x8xf32> to vector<64x1xf32>
    %59 = vector.extract_strided_slice %28 {offsets = [5, 0], sizes = [1, 512], strides = [1, 1]} : vector<8x512xf32> to vector<1x512xf32>
    %60 = vector.broadcast %58 : vector<64x1xf32> to vector<64x512xf32>
    %61 = vector.broadcast %59 : vector<1x512xf32> to vector<64x512xf32>
    %62 = arith.mulf %60, %61 : vector<64x512xf32>
    %63 = arith.addf %57, %62 : vector<64x512xf32>
    %64 = vector.extract_strided_slice %1 {offsets = [0, 6], sizes = [64, 1], strides = [1, 1]} : vector<64x8xf32> to vector<64x1xf32>
    %65 = vector.extract_strided_slice %28 {offsets = [6, 0], sizes = [1, 512], strides = [1, 1]} : vector<8x512xf32> to vector<1x512xf32>
    %66 = vector.broadcast %64 : vector<64x1xf32> to vector<64x512xf32>
    %67 = vector.broadcast %65 : vector<1x512xf32> to vector<64x512xf32>
    %68 = arith.mulf %66, %67 : vector<64x512xf32>
    %69 = arith.addf %63, %68 : vector<64x512xf32>
    %70 = vector.extract_strided_slice %1 {offsets = [0, 7], sizes = [64, 1], strides = [1, 1]} : vector<64x8xf32> to vector<64x1xf32>
    %71 = vector.extract_strided_slice %28 {offsets = [7, 0], sizes = [1, 512], strides = [1, 1]} : vector<8x512xf32> to vector<1x512xf32>
    %72 = vector.broadcast %70 : vector<64x1xf32> to vector<64x512xf32>
    %73 = vector.broadcast %71 : vector<1x512xf32> to vector<64x512xf32>
    %74 = arith.mulf %72, %73 : vector<64x512xf32>
    %75 = arith.addf %69, %74 : vector<64x512xf32>
    %76 = vector.extract_strided_slice %75 {offsets = [0, 0], sizes = [8, 512], strides = [1, 1]} : vector<64x512xf32> to vector<8x512xf32>
    %77 = vector.extract_strided_slice %10 {offsets = [0, 0], sizes = [1, 512], strides = [1, 1]} : vector<8x512xf32> to vector<1x512xf32>
    %78 = vector.broadcast %77 : vector<1x512xf32> to vector<8x512xf32>
    %79 = arith.mulf %76, %78 : vector<8x512xf32>
    %80 = vector.extract_strided_slice %75 {offsets = [8, 0], sizes = [8, 512], strides = [1, 1]} : vector<64x512xf32> to vector<8x512xf32>
    %81 = vector.extract_strided_slice %10 {offsets = [1, 0], sizes = [1, 512], strides = [1, 1]} : vector<8x512xf32> to vector<1x512xf32>
    %82 = vector.broadcast %81 : vector<1x512xf32> to vector<8x512xf32>
    %83 = arith.mulf %80, %82 : vector<8x512xf32>
    %84 = arith.addf %79, %83 : vector<8x512xf32>
    %85 = vector.extract_strided_slice %75 {offsets = [16, 0], sizes = [8, 512], strides = [1, 1]} : vector<64x512xf32> to vector<8x512xf32>
    %86 = vector.extract_strided_slice %10 {offsets = [2, 0], sizes = [1, 512], strides = [1, 1]} : vector<8x512xf32> to vector<1x512xf32>
    %87 = vector.broadcast %86 : vector<1x512xf32> to vector<8x512xf32>
    %88 = arith.mulf %85, %87 : vector<8x512xf32>
    %89 = arith.addf %84, %88 : vector<8x512xf32>
    %90 = vector.extract_strided_slice %75 {offsets = [24, 0], sizes = [8, 512], strides = [1, 1]} : vector<64x512xf32> to vector<8x512xf32>
    %91 = vector.extract_strided_slice %10 {offsets = [3, 0], sizes = [1, 512], strides = [1, 1]} : vector<8x512xf32> to vector<1x512xf32>
    %92 = vector.broadcast %91 : vector<1x512xf32> to vector<8x512xf32>
    %93 = arith.mulf %90, %92 : vector<8x512xf32>
    %94 = arith.addf %89, %93 : vector<8x512xf32>
    %95 = vector.extract_strided_slice %75 {offsets = [32, 0], sizes = [8, 512], strides = [1, 1]} : vector<64x512xf32> to vector<8x512xf32>
    %96 = vector.extract_strided_slice %10 {offsets = [4, 0], sizes = [1, 512], strides = [1, 1]} : vector<8x512xf32> to vector<1x512xf32>
    %97 = vector.broadcast %96 : vector<1x512xf32> to vector<8x512xf32>
    %98 = arith.mulf %95, %97 : vector<8x512xf32>
    %99 = arith.addf %94, %98 : vector<8x512xf32>
    %100 = vector.extract_strided_slice %75 {offsets = [40, 0], sizes = [8, 512], strides = [1, 1]} : vector<64x512xf32> to vector<8x512xf32>
    %101 = vector.extract_strided_slice %10 {offsets = [5, 0], sizes = [1, 512], strides = [1, 1]} : vector<8x512xf32> to vector<1x512xf32>
    %102 = vector.broadcast %101 : vector<1x512xf32> to vector<8x512xf32>
    %103 = arith.mulf %100, %102 : vector<8x512xf32>
    %104 = arith.addf %99, %103 : vector<8x512xf32>
    %105 = vector.extract_strided_slice %75 {offsets = [48, 0], sizes = [8, 512], strides = [1, 1]} : vector<64x512xf32> to vector<8x512xf32>
    %106 = vector.extract_strided_slice %10 {offsets = [6, 0], sizes = [1, 512], strides = [1, 1]} : vector<8x512xf32> to vector<1x512xf32>
    %107 = vector.broadcast %106 : vector<1x512xf32> to vector<8x512xf32>
    %108 = arith.mulf %105, %107 : vector<8x512xf32>
    %109 = arith.addf %104, %108 : vector<8x512xf32>
    %110 = vector.extract_strided_slice %75 {offsets = [56, 0], sizes = [8, 512], strides = [1, 1]} : vector<64x512xf32> to vector<8x512xf32>
    %111 = vector.extract_strided_slice %10 {offsets = [7, 0], sizes = [1, 512], strides = [1, 1]} : vector<8x512xf32> to vector<1x512xf32>
    %112 = vector.broadcast %111 : vector<1x512xf32> to vector<8x512xf32>
    %113 = arith.mulf %110, %112 : vector<8x512xf32>
    %114 = arith.addf %109, %113 : vector<8x512xf32>
    %115 = vector.extract_strided_slice %114 {offsets = [0, 0], sizes = [1, 512], strides = [1, 1]} : vector<8x512xf32> to vector<1x512xf32>
    %116 = vector.extract_strided_slice %19 {offsets = [0, 0], sizes = [1, 512], strides = [1, 1]} : vector<8x512xf32> to vector<1x512xf32>
    %117 = arith.mulf %115, %116 : vector<1x512xf32>
    %118 = vector.extract_strided_slice %114 {offsets = [1, 0], sizes = [1, 512], strides = [1, 1]} : vector<8x512xf32> to vector<1x512xf32>
    %119 = vector.extract_strided_slice %19 {offsets = [1, 0], sizes = [1, 512], strides = [1, 1]} : vector<8x512xf32> to vector<1x512xf32>
    %120 = arith.mulf %118, %119 : vector<1x512xf32>
    %121 = arith.addf %117, %120 : vector<1x512xf32>
    %122 = vector.extract_strided_slice %114 {offsets = [2, 0], sizes = [1, 512], strides = [1, 1]} : vector<8x512xf32> to vector<1x512xf32>
    %123 = vector.extract_strided_slice %19 {offsets = [2, 0], sizes = [1, 512], strides = [1, 1]} : vector<8x512xf32> to vector<1x512xf32>
    %124 = arith.mulf %122, %123 : vector<1x512xf32>
    %125 = arith.addf %121, %124 : vector<1x512xf32>
    %126 = vector.extract_strided_slice %114 {offsets = [3, 0], sizes = [1, 512], strides = [1, 1]} : vector<8x512xf32> to vector<1x512xf32>
    %127 = vector.extract_strided_slice %19 {offsets = [3, 0], sizes = [1, 512], strides = [1, 1]} : vector<8x512xf32> to vector<1x512xf32>
    %128 = arith.mulf %126, %127 : vector<1x512xf32>
    %129 = arith.addf %125, %128 : vector<1x512xf32>
    %130 = vector.extract_strided_slice %114 {offsets = [4, 0], sizes = [1, 512], strides = [1, 1]} : vector<8x512xf32> to vector<1x512xf32>
    %131 = vector.extract_strided_slice %19 {offsets = [4, 0], sizes = [1, 512], strides = [1, 1]} : vector<8x512xf32> to vector<1x512xf32>
    %132 = arith.mulf %130, %131 : vector<1x512xf32>
    %133 = arith.addf %129, %132 : vector<1x512xf32>
    %134 = vector.extract_strided_slice %114 {offsets = [5, 0], sizes = [1, 512], strides = [1, 1]} : vector<8x512xf32> to vector<1x512xf32>
    %135 = vector.extract_strided_slice %19 {offsets = [5, 0], sizes = [1, 512], strides = [1, 1]} : vector<8x512xf32> to vector<1x512xf32>
    %136 = arith.mulf %134, %135 : vector<1x512xf32>
    %137 = arith.addf %133, %136 : vector<1x512xf32>
    %138 = vector.extract_strided_slice %114 {offsets = [6, 0], sizes = [1, 512], strides = [1, 1]} : vector<8x512xf32> to vector<1x512xf32>
    %139 = vector.extract_strided_slice %19 {offsets = [6, 0], sizes = [1, 512], strides = [1, 1]} : vector<8x512xf32> to vector<1x512xf32>
    %140 = arith.mulf %138, %139 : vector<1x512xf32>
    %141 = arith.addf %137, %140 : vector<1x512xf32>
    %142 = vector.extract_strided_slice %114 {offsets = [7, 0], sizes = [1, 512], strides = [1, 1]} : vector<8x512xf32> to vector<1x512xf32>
    %143 = vector.extract_strided_slice %19 {offsets = [7, 0], sizes = [1, 512], strides = [1, 1]} : vector<8x512xf32> to vector<1x512xf32>
    %144 = arith.mulf %142, %143 : vector<1x512xf32>
    %145 = arith.addf %141, %144 : vector<1x512xf32>
    %c0_17 = arith.constant 0 : index
    %c0_18 = arith.constant 0 : index
    %146 = vector.load %arg6[%c0_17, %c0_18] : memref<1x512xf32, #tpu.memory_space<vmem>>, vector<1x512xf32>
    tpu.vector_store %arg6[%c0_17, %c0_18], %145 {strides = array<i32>} : memref<1x512xf32, #tpu.memory_space<vmem>>, vector<1x512xf32>,
    return
  }
  func.func @transform_0(%arg0: i32) -> (i32, i32) {
    %c0_i32 = arith.constant 0 : i32
    %c0_i32_0 = arith.constant 0 : i32
    return %c0_i32, %arg0 : i32, i32
  }
  func.func @transform_1(%arg0: i32) -> (i32, i32) {
    %c0_i32 = arith.constant 0 : i32
    %c0_i32_0 = arith.constant 0 : i32
    %c0_i32_1 = arith.constant 0 : i32
    return %c0_i32, %c0_i32_0 : i32, i32
  }
  func.func @transform_2(%arg0: i32) -> (i32, i32) {
    %c0_i32 = arith.constant 0 : i32
    %c0_i32_0 = arith.constant 0 : i32
    %c0_i32_1 = arith.constant 0 : i32
    return %c0_i32, %c0_i32_0 : i32, i32
  }
  func.func @transform_3(%arg0: i32) -> (i32, i32) {
    %c0_i32 = arith.constant 0 : i32
    %c0_i32_0 = arith.constant 0 : i32
    %c0_i32_1 = arith.constant 0 : i32
    return %c0_i32, %c0_i32_0 : i32, i32
  }
  func.func @transform_4(%arg0: i32) -> (i32, i32) {
    %c0_i32 = arith.constant 0 : i32
    %c0_i32_0 = arith.constant 0 : i32
    %c0_i32_1 = arith.constant 0 : i32
    return %c0_i32, %c0_i32_0 : i32, i32
  }
  func.func @transform_5(%arg0: i32) -> (i32, i32) {
    %c0_i32 = arith.constant 0 : i32
    %c0_i32_0 = arith.constant 0 : i32
    return %c0_i32, %arg0 : i32, i32
  }
}

</mosaic_0001>

<bundles_post_ra>
// kernel: tpu_custom_call.1
= control target key start
LH: loop header
LB: loop body
LE: loop exit
PB: predicated region body
PF: predicated region fallthrough
CT: control target
= control target key end

     0   :  { %10 = vsyncpa [#allocation3], 0  ;;  %s3648_s0 = inlined_call_operand.vmem [shape: s32[3,1024], index: 0, kind: input, shape index: {}]   ;;  %s3649_s1 = inlined_call_operand.vmem [shape: f32[64,8], index: 1, kind: input, shape index: {}]   ;;  %s3650_s2 = inlined_call_operand.vmem [shape: f32[8,16], index: 2, kind: input, shape index: {}]   ;;  %s3651_s3 = inlined_call_operand.vmem [shape: f32[8,12], index: 3, kind: input, shape index: {}]   ;;  %s3652_s4 = inlined_call_operand.vmem [shape: f32[8,20], index: 4, kind: input, shape index: {}]   ;;  %s3653_s5 = inlined_call_operand.hbm [shape: f32[1,1024], index: 5, kind: output, shape index: {}]  }
   0x1   :  { %12 = vsyncpa [#allocation3 + $0x1], 0  ;;  %s2382_s18 = smov 0   ;;  %s2384_s19 = smov 0  }
   0x2   :  { %s2386_s20 = smov 0   ;;  %s2388_s21 = smov 0  }
   0x3 LB: > { %s2403_s22 = sadd.s32 4294967295, %s2337_s21   ;;  %s2118_s23 = sadd.s32 4294967294, %s2337_s21   ;;  %s2337_s21 = sphi %s2388_s21, %s3903_s21   ;;  %s2333_s20 = sphi %s2386_s20, %s3902_s20   ;;  %s2329_s19 = sphi %s2384_s19, %s3901_s19   ;;  %s2325_s18 = sphi %s2382_s18, %s3900_s18  }
   0x4   : > { %s2407_s24 = sadd.s32 1, %s2337_s21   ;;  %s135_s25 = sadd.s32 1, %s2333_s20 }
   0x5   : > { %s132_s26 = ssub.s32 %s2337_s21, %s2407_s24  ;;  %p145_p0 = scmp.ne.s32.totalorder %s2333_s20, %s2329_s19 }
   0x6   : > { %p133_p1 = scmp.eq.s32.totalorder %s132_s26, 0  ;;  %p146_p2 = scmp.eq.s32.totalorder %s2403_s22, 1 }
   0x7   : > { %p151_p3 = scmp.ne.s32.totalorder %s2329_s19, %s2325_s18  ;;  %p152_p4 = scmp.eq.s32.totalorder %s2118_s23, 1 }
   0x8   : > { %s2418_s27 = scalar_select %p133_p1, %s2333_s20, %s135_s25  }
   0x9   : > { %p2420_p5 = por %p146_p2, %p145_p0  ;;  %p2424_p6 = por %p152_p4, %p151_p3 }
   0xa   : > { %p2121_p7 = scmp.ge.s32.totalorder %s2337_s21, 1  ;;  %p191_p8 = scmp.lt.s32.totalorder %s2337_s21, 3 }
   0xc   : > { %p192_p9 = pnand %p2121_p7, %p191_p8 }
   0xe   : > { %195 = sbr.rel (%p192_p9) target bundleno = 460 (0x1cc), region = 40 }
  0x15   : > { %v2433_v0 = vld [vmem:[%s3649_s1 + $0x10] sm:$0xff]  ;;  %s2123_s7 = sshll.u32 %s2403_s22, 2  ;;  %v3654_v1 = vlaneseq  ;;  %v2339_v2 = vmov 0   ;;  %v2340_v3 = vmov 0.0   ;;  %v2445_v5 = vld [vmem:[%s3649_s1 + $0x18] sm:$0xff]  ;;  %v2450_v6 = vld [vmem:[%s3649_s1] sm:$0xff] }
  0x16   : > { %2245 = vset.pattern.permute.xlu1 %v2339_v2  ;;  %p220_p10 = scmp.lt.s32.totalorder %s2123_s7, 7  ;;  %356 = vmatprep.mubr.f32.mxu0 %v2340_v3  ;;  %v2469_v11 = vld [vmem:[%s3649_s1 + $0x28] sm:$0xff]  ;;  %vm487_vm0 = vcmask 1043456   ;;  %vm288_vm1 = vcmask 130048   ;;  %v2517_v30 = vld [vmem:[%s3649_s1 + $0x38] sm:$0xff]  ;;  %v2526_v35 = vld [vmem:[%s3649_s1 + $0x20] sm:$0xff] }
  0x17   : > { %870 = vperm.xlu1 %2245, %v2433_v0   ;;  %v2439_v4 = vshrl.u32 %v3654_v1, 7  ;;  %427 = vmatprep.mubr.f32.mxu1 %v2340_v3  ;;  %v2480_v13 = vld [vmem:[%s3649_s1 + $0x8] sm:$0xff]  ;;  %v2341_v36 = vmov 1.0|1.0   ;;  %v2553_v39 = vld [vmem:[%s3649_s1 + $0x30] sm:$0xff]  ;;  %v2342_v40 = vmov 1.0  }
  0x18   : > { %s3905_s7 = smov (!%p220_p10, %s2123_s7), 7  ;;  %2244 = vset.pattern.permute.xlu0 %v2339_v2  ;;  %v236_v45 = vld [vmem:[%s3650_s2] sm:$0xff]  ;;  %v2343_v48 = vmov 1   ;;  %v2344_v2 = vmov 2   ;;  %s216_s16 = sand.u32 1, %s2329_s19  }
  0x19   : > { %3733 = vst [vmem:[#allocation5_spill] sm:$0xff] %v2439_v4  ;;  %v2453_v7 = vsub.s32 0, %v2439_v4  ;;  %v2456_v8 = vsub.s32 4, %v2439_v4  ;;  %860 = vperm.xlu0 %2244, %v2450_v6   ;;  %s2124_s12 = sshll.u32 %s3905_s7, 2  ;;  %v2460_v9 = vsub.s32 1, %v2439_v4  ;;  %v2463_v10 = vsub.s32 5, %v2439_v4 }
  0x1a   : > { %s223_s17 = scalar_lea.vmem %s3648_s0, %s2124_s12  ;;  %v2475_v12 = vadd.s32 8, %v2439_v4  ;;  %v2487_v16 = vsub.s32 2, %v2439_v4  ;;  %v2490_v17 = vsub.s32 6, %v2439_v4  ;;  %v2543_v37 = vadd.s32 16, %v2439_v4  ;;  %v434_v58 = vld [vmem:[%s3651_s3] sm:$0xff]  ;;  %s2164_s23 = sshll.u32 %s2403_s22, 6 }
  0x1b   : > { %3734 = vst [vmem:[#allocation6_spill] sm:$0xff] %v2453_v7  ;;  %3735 = vst [vmem:[#allocation7_spill] sm:$0xff] %v2456_v8  ;;  %875 = vperm.xlu1 %2245, %v2445_v5   ;;  %v2482_v14 = vld [vmem:[%s223_s17] sm:$0x77]  ;;  %v2484_v15 = vld [vmem:[%s223_s17 + $0x8] sm:$0x77]  ;;  %s3604_s7 = scalar_lea.hbm %s3653_s5, %s2164_s23 }
  0x1c   : > { %3736 = vst [vmem:[#allocation8_spill] sm:$0xff] %v2460_v9  ;;  %3737 = vst [vmem:[#allocation9_spill] sm:$0xff] %v2463_v10  ;;  %v247_v18 = vrot.slane %v2482_v14, %v2456_v8  ;;  %v255_v19 = vrot.slane %v2484_v15, %v2456_v8  ;;  %v243_v20 = vrot.slane %v2482_v14, %v2453_v7  ;;  %v642_v63 = vld [vmem:[%s3652_s4] sm:$0xff]  ;;  %s2122_s17 = sshll.u32 %s216_s16, 2  ;;  %s2045_s8 = scalar_lea.sflag [#allocation3], %s216_s16 }
  0x1d   : > { %3738 = vst [vmem:[#allocation10_spill] sm:$0xff] %v2487_v16  ;;  %3739 = vst [vmem:[#allocation11_spill] sm:$0xff] %v2490_v17  ;;  %v251_v21 = vrot.slane %v2484_v15, %v2453_v7  ;;  %865 = vperm.xlu0 %2244, %v2480_v13   ;;  %v442_v22 = vrot.slane %v2482_v14, %v2463_v10  ;;  %v450_v23 = vrot.slane %v2484_v15, %v2463_v10  ;;  %s218_s25 = scalar_lea.vmem [#allocation2], %s2122_s17  ;;  %s2351_s9 = smov [#allocation2]  }
  0x1e   : > { %v438_v24 = vrot.slane %v2482_v14, %v2460_v9  ;;  %v446_v25 = vrot.slane %v2484_v15, %v2460_v9  ;;  %v263_v26 = vrot.slane %v247_v18, %v2453_v7  ;;  %v271_v27 = vrot.slane %v255_v19, %v2453_v7  ;;  %s2059_s26 = sshll.u32 %s218_s25, 4  ;;  %s2279_s10 = sshll.u32 %s2351_s9, 4  ;;  %s3606_s26 = int_to_ptr.vmem [resolvable:$true] %s2059_s26  ;;  %s2280_s10 = int_to_ptr.vmem [resolvable:$false] %s2279_s10 }
  0x1f   : > { %885 = vperm.xlu1 %2245, %v2469_v11   ;;  %v259_v28 = vrot.slane %v243_v20, %v2453_v7  ;;  %v267_v29 = vrot.slane %v251_v21, %v2453_v7  ;;  %v458_v31 = vrot.slane %v442_v22, %v2460_v9  ;;  %v466_v32 = vrot.slane %v450_v23, %v2460_v9  ;;  %s2275_s22 = scalar_lea.vmem %s3606_s26, 64  ;;  %s2281_s11 = scalar_lea.vmem %s2280_s10, 128 }
  0x20   : > { %v454_v33 = vrot.slane %v438_v24, %v2460_v9  ;;  %v462_v34 = vrot.slane %v446_v25, %v2460_v9  ;;  %vm273_vm2 = vcmp.eq.s32.totalorder %v2439_v4, %v263_v26  ;;  %vm277_vm3 = vcmp.eq.s32.totalorder %v2475_v12, %v263_v26  ;;  %p2276_p11 = scmp.ne.s32.totalorder %s3606_s26, %s2275_s22  ;;  %p2282_p0 = scmp.lt.s32.totalorder %s3606_s26, %s2280_s10 }
  0x21   : > { %vm275_vm4 = vcmp.eq.s32.totalorder %v2439_v4, %v271_v27  ;;  %vm279_vm5 = vcmp.eq.s32.totalorder %v2475_v12, %v271_v27  ;;  %880 = vperm.xlu0 %2244, %v2526_v35   ;;  %vm2165_vm6 = vmpackc.low %vm277_vm3, %vm273_vm2  ;;  %vm272_vm7 = vcmp.eq.s32.totalorder %v2439_v4, %v259_v28  ;;  %vm276_vm8 = vcmp.eq.s32.totalorder %v2475_v12, %v259_v28  ;;  %p2283_p1 = scmp.lt.s32.totalorder %s2281_s11, %s2275_s22 }
  0x22   : > { %vm274_vm9 = vcmp.eq.s32.totalorder %v2439_v4, %v267_v29  ;;  %vm278_vm10 = vcmp.eq.s32.totalorder %v2475_v12, %v267_v29  ;;  %2166 = vmatprep.subr.msk.bf16.mxu0 %vm2165_vm6, %v2341_v36  ;;  %vm2169_vm11 = vmpackc.low %vm279_vm5, %vm275_vm4  ;;  %vm468_vm12 = vcmp.eq.s32.totalorder %v2439_v4, %v458_v31  ;;  %vm472_vm13 = vcmp.eq.s32.totalorder %v2475_v12, %v458_v31  ;;  %p2277_p12 = pnand %p2276_p11, %p2420_p5 }
  0x23   : > { %895 = vperm.xlu1 %2245, %v2517_v30   ;;  %vm470_vm14 = vcmp.eq.s32.totalorder %v2439_v4, %v466_v32  ;;  %2170 = vmatprep.subr.msk.bf16.mxu1 %vm2169_vm11, %v2341_v36  ;;  %vm2167_vm15 = vmpackc.low %vm276_vm8, %vm272_vm7  ;;  %v480_v38 = vsel %vm472_vm13, 1.0, %v2340_v3  ;;  %vm474_vm2 = vcmp.eq.s32.totalorder %v2475_v12, %v466_v32  ;;  %vm467_vm3 = vcmp.eq.s32.totalorder %v2439_v4, %v454_v33  ;;  %p2284_p2 = por %p2283_p1, %p2282_p0 }
  0x24   : > { %vm471_vm4 = vcmp.eq.s32.totalorder %v2475_v12, %v454_v33  ;;  %2168 = vmatpush1.bf16.msk.msra.mxu0 %vm2167_vm15, %v2341_v36  ;;  %vm2171_vm5 = vmpackc.low %vm278_vm10, %vm274_vm9  ;;  %v2173_v41 = vpack.c.bf16 %v480_v38, %v2342_v40  ;;  %v482_v42 = vsel %vm474_vm2, 1.0, %v2340_v3  ;;  %vm469_vm6 = vcmp.eq.s32.totalorder %v2439_v4, %v462_v34  ;;  %p2278_p13 = pneg %p2277_p12 }
  0x25   : > { %v479_v43 = vsel %vm471_vm4, 1.0, %v2340_v3  ;;  %890 = vperm.xlu0 %2244, %v2553_v39   ;;  %2172 = vmatpush1.bf16.msk.msra.mxu1 %vm2171_vm5, %v2341_v36  ;;  %vm2174_vm7 = vmpackc.low %vm487_vm0, %vm468_vm12  ;;  %v2179_v44 = vpack.c.bf16 %v482_v42, %v2342_v40  ;;  %vm473_vm8 = vcmp.eq.s32.totalorder %v2475_v12, %v462_v34  ;;  %v651_v47 = vrot.slane %v2482_v14, %v2490_v17 }
  0x26   : > { %v2176_v46 = vpack.c.bf16 %v479_v43, %v2342_v40  ;;  %2175 = vmatprep.subr.msk.bf16.mxu0 %vm2174_vm7, %v2173_v41  ;;  %vm2180_vm9 = vmpackc.low %vm487_vm0, %vm470_vm14  ;;  %v481_v49 = vsel %vm473_vm8, 1.0, %v2340_v3  ;;  %v659_v50 = vrot.slane %v2484_v15, %v2490_v17  ;;  %v647_v51 = vrot.slane %v2482_v14, %v2487_v16  ;;  %p2285_p3 = pnand %p2284_p2, %p2278_p13 }
  0x27   : > { %2247 = vset.pattern.permute.xlu1 %v2343_v48  ;;  %v655_v52 = vrot.slane %v2484_v15, %v2487_v16  ;;  %2181 = vmatprep.subr.msk.bf16.mxu1 %vm2180_vm9, %v2179_v44  ;;  %vm2177_vm10 = vmpackc.low %vm487_vm0, %vm467_vm3  ;;  %v2182_v53 = vpack.c.bf16 %v481_v49, %v2342_v40  ;;  %v667_v54 = vrot.slane %v651_v47, %v2487_v16  ;;  %v2347_v14 = vmov 6  }
  0x28   : > { %951 = vperm.xlu1 %2247, %v2480_v13   ;;  %2129 = vmatmul.mubr.msk.f32.vlgmr.msra.gmra.mrb[0].mxu0 %vm288_vm1, %v236_v45  ;;  %vm2183_vm11 = vmpackc.low %vm487_vm0, %vm469_vm6  ;;  %v675_v55 = vrot.slane %v659_v50, %v2487_v16  ;;  %v663_v56 = vrot.slane %v647_v51, %v2487_v16  ;;  %v2348_v15 = vmov 5   ;;  %v2349_v18 = vmov 7  }
  0x29   : > { %2134 = vmatmul.mubr.msk.f32.vlgmr.msra.gmra.mrb[0].mxu1 %vm288_vm1, %v236_v45  ;;  %v671_v57 = vrot.slane %v655_v52, %v2487_v16  ;;  %2178 = vmatpush1.bf16.msk.msra.mxu0 %vm2177_vm10, %v2176_v46  ;;  %vm677_vm12 = vcmp.eq.s32.totalorder %v2439_v4, %v667_v54  ;;  %vm681_vm13 = vcmp.eq.s32.totalorder %v2475_v12, %v667_v54  ;;  %vm483_vm1 = vcmask 97280  }
  0x2a   : > { %2184 = vmatpush1.bf16.msk.msra.mxu1 %vm2183_vm11, %v2182_v53  ;;  %vm685_vm14 = vcmp.eq.s32.totalorder %v2543_v37, %v667_v54  ;;  %564 = vmatprep.mubr.f32.mxu0 %v2340_v3  ;;  %vm2185_vm15 = vmpackc.low %vm681_vm13, %vm677_vm12  ;;  %vm679_vm2 = vcmp.eq.s32.totalorder %v2439_v4, %v675_v55  ;;  %vm683_vm3 = vcmp.eq.s32.totalorder %v2475_v12, %v675_v55 }
  0x2b   : > { %635 = vmatprep.mubr.f32.mxu1 %v2340_v3  ;;  %vm676_vm4 = vcmp.eq.s32.totalorder %v2439_v4, %v663_v56  ;;  %2186 = vmatprep.subr.msk.bf16.mxu0 %vm2185_vm15, %v2341_v36  ;;  %vm2189_vm5 = vmpackc.low %vm683_vm3, %vm679_vm2  ;;  %vm680_vm6 = vcmp.eq.s32.totalorder %v2475_v12, %v663_v56  ;;  %vm678_vm7 = vcmp.eq.s32.totalorder %v2439_v4, %v671_v57  ;;  %v697_v59 = vsel %vm685_vm14, 1.0, %v2340_v3 }
  0x2c   : > { %955 = vperm.xlu1 %2247, %v2433_v0   ;;  %vm682_vm8 = vcmp.eq.s32.totalorder %v2475_v12, %v671_v57  ;;  %2190 = vmatprep.subr.msk.bf16.mxu1 %vm2189_vm5, %v2341_v36  ;;  %vm2187_vm9 = vmpackc.low %vm680_vm6, %vm676_vm4  ;;  %vm687_vm10 = vcmp.eq.s32.totalorder %v2543_v37, %v675_v55  ;;  %vm684_vm11 = vcmp.eq.s32.totalorder %v2543_v37, %v663_v56  ;;  %v2346_v12 = vmov 4  }
  0x2d   : > { %2139 = vmatmul.mubr.msk.f32.vlgmr.msra.gmra.mrb[2].mxu0 %vm483_vm1, %v434_v58  ;;  %vm686_vm12 = vcmp.eq.s32.totalorder %v2543_v37, %v671_v57  ;;  %2144 = vmatmul.mubr.msk.f32.vlgmr.msra.gmra.mrb[2].mxu1 %vm483_vm1, %v434_v58  ;;  %vm2191_vm13 = vmpackc.low %vm682_vm8, %vm678_vm7  ;;  %v699_v60 = vsel %vm687_vm10, 1.0, %v2340_v3  ;;  %v696_v61 = vsel %vm684_vm11, 1.0, %v2340_v3  ;;  %vm700_vm1 = vcmask 162816  }
  0x2e   : > { %2188 = vmatpush1.bf16.msk.msra.mxu0 %vm2187_vm9, %v2341_v36  ;;  %2192 = vmatpush1.bf16.msk.msra.mxu1 %vm2191_vm13, %v2341_v36  ;;  %v698_v62 = vsel %vm686_vm12, 1.0, %v2340_v3 }
  0x2f   : > { %2149 = vmatprep.subr.msk.mxu0 %vm487_vm0, %v697_v59  ;;  %2156 = vmatprep.subr.msk.mxu1 %vm487_vm0, %v699_v60 }
  0x30   : > { %963 = vperm.xlu1 %2247, %v2526_v35   ;;  %780 = vmatprep.mubr.f32.mxu0 %v2340_v3 }
  0x31   : > { %851 = vmatprep.mubr.f32.mxu1 %v2340_v3  ;;  %2246 = vset.pattern.permute.xlu0 %v2343_v48  ;;  %v2345_v3 = vmov 3  }
  0x32   : > { %2150 = vmatpush1.msk.msra.mxu0 %vm487_vm0, %v696_v61  ;;  %2157 = vmatpush1.msk.msra.mxu1 %vm487_vm0, %v698_v62  ;;  %v2783_v61 = vsub.s32 3, %v2439_v4  ;;  %v2786_v62 = vsub.s32 7, %v2439_v4 }
  0x33   : > { %2151 = vmatmul.mubr.msk.f32.vlgmr.msra.gmra.mrb[4].mxu0 %vm700_vm1, %v642_v63  ;;  %2158 = vmatmul.mubr.msk.f32.vlgmr.msra.gmra.mrb[4].mxu1 %vm700_vm1, %v642_v63 }
  0x34   : > { %971 = vperm.xlu1 %2247, %v2553_v39   ;;  %947 = vperm.xlu0 %2246, %v2450_v6   ;;  %3772 = vst [vmem:[#allocation44_spill] sm:$0xff] %v2783_v61  ;;  %3773 = vst [vmem:[#allocation45_spill] sm:$0xff] %v2786_v62 }
  0x38   : > { %2248 = vset.pattern.permute.xlu1 %v2344_v2  ;;  %959 = vperm.xlu0 %2246, %v2445_v5  }
  0x39   : > { %1059 = vperm.xlu1 %2248, %v2450_v6  }
  0x3c   : > { %967 = vperm.xlu0 %2246, %v2469_v11  }
  0x3d   : > { %1067 = vperm.xlu1 %2248, %v2433_v0  }
  0x40   : > { %975 = vperm.xlu0 %2246, %v2517_v30  }
  0x41   : > { %1071 = vperm.xlu1 %2248, %v2445_v5  }
  0x44   : > { %2249 = vset.pattern.permute.xlu0 %v2344_v2 }
  0x45   : > { %1079 = vperm.xlu1 %2248, %v2469_v11   ;;  %1063 = vperm.xlu0 %2249, %v2480_v13  }
  0x49   : > { %1087 = vperm.xlu1 %2248, %v2517_v30   ;;  %1075 = vperm.xlu0 %2249, %v2526_v35  }
  0x4d   : > { %2251 = vset.pattern.permute.xlu1 %v2345_v3  ;;  %1083 = vperm.xlu0 %2249, %v2553_v39  }
  0x4e   : > { %1175 = vperm.xlu1 %2251, %v2480_v13  }
  0x51   : > { %2250 = vset.pattern.permute.xlu0 %v2345_v3 }
  0x52   : > { %1179 = vperm.xlu1 %2251, %v2433_v0   ;;  %1171 = vperm.xlu0 %2250, %v2450_v6  }
  0x56   : > { %1187 = vperm.xlu1 %2251, %v2526_v35   ;;  %1183 = vperm.xlu0 %2250, %v2445_v5  }
  0x5a   : > { %1195 = vperm.xlu1 %2251, %v2553_v39   ;;  %1191 = vperm.xlu0 %2250, %v2469_v11  }
  0x5e   : > { %2252 = vset.pattern.permute.xlu1 %v2346_v12  ;;  %1199 = vperm.xlu0 %2250, %v2517_v30  }
  0x5f   : > { %1283 = vperm.xlu1 %2252, %v2450_v6  }
  0x62   : > { %2256 = vset.pattern.permute.xlu0 %v2347_v14 }
  0x63   : > { %1291 = vperm.xlu1 %2252, %v2433_v0   ;;  %1507 = vperm.xlu0 %2256, %v2450_v6  }
  0x67   : > { %2253 = vset.pattern.permute.xlu1 %v2348_v15  ;;  %1519 = vperm.xlu0 %2256, %v2445_v5  }
  0x68   : > { %1395 = vperm.xlu1 %2253, %v2450_v6  }
  0x6b   : > { %2263 = vset.pattern.permute.xlu0 %v2348_v15 }
  0x6c   : > { %2254 = vset.pattern.permute.xlu1 %v2346_v12  ;;  %1399 = vperm.xlu0 %2263, %v2480_v13  }
  0x6d   : > { %1295 = vperm.xlu1 %2254, %v2445_v5  }
  0x70   : > { %1407 = vperm.xlu0 %2263, %v2445_v5  }
  0x71   : > { %2255 = vset.pattern.permute.xlu1 %v2348_v15 }
  0x72   : > { %1403 = vperm.xlu1 %2255, %v2433_v0  }
  0x74   : > { %1415 = vperm.xlu0 %2263, %v2469_v11  }
  0x76   : > { %2257 = vset.pattern.permute.xlu1 %v2347_v14 }
  0x77   : > { %1511 = vperm.xlu1 %2257, %v2480_v13  }
  0x78   : > { %2266 = vset.pattern.permute.xlu0 %v2346_v12 }
  0x79   : > { %1287 = vperm.xlu0 %2266, %v2480_v13  }
  0x7b   : > { %2258 = vset.pattern.permute.xlu1 %v2346_v12 }
  0x7c   : > { %1299 = vperm.xlu1 %2258, %v2526_v35  }
  0x7d   : > { %1311 = vperm.xlu0 %2266, %v2517_v30  }
  0x80   : > { %2259 = vset.pattern.permute.xlu1 %v2347_v14 }
  0x81   : > { %1515 = vperm.xlu1 %2259, %v2433_v0   ;;  %2269 = vset.pattern.permute.xlu0 %v2349_v18 }
  0x82   : > { %1623 = vperm.xlu0 %2269, %v2480_v13  }
  0x85   : > { %2260 = vset.pattern.permute.xlu1 %v2349_v18 }
  0x86   : > { %1619 = vperm.xlu1 %2260, %v2450_v6   ;;  %1635 = vperm.xlu0 %2269, %v2526_v35  }
  0x8a   : > { %2261 = vset.pattern.permute.xlu1 %v2346_v12  ;;  %1639 = vperm.xlu0 %2269, %v2469_v11  }
  0x8b   : > { %1303 = vperm.xlu1 %2261, %v2469_v11  }
  0x8e   : > { %1643 = vperm.xlu0 %2269, %v2553_v39  }
  0x8f   : > { %2262 = vset.pattern.permute.xlu1 %v2348_v15 }
  0x90   : > { %1411 = vperm.xlu1 %2262, %v2526_v35  }
  0x94   : > { %2264 = vset.pattern.permute.xlu1 %v2349_v18 }
  0x95   : > { %1627 = vperm.xlu1 %2264, %v2433_v0  }
  0x96   : > { %v2679_v19 = vpop.permute.xlu1 %870 }
  0x97   : > { %3740 = vst [vmem:[#allocation12_spill] sm:$0xff] %v2679_v19 }
  0x98   : > { %v2690_v21 = vpop.permute.xlu0 %860 }
  0x99   : > { %2265 = vset.pattern.permute.xlu1 %v2346_v12  ;;  %3742 = vst [vmem:[#allocation14_spill] sm:$0xff] %v2690_v21 }
  0x9a   : > { %v2681_v13 = vpop.permute.xlu1 %875  ;;  %1307 = vperm.xlu1 %2265, %v2553_v39  }
  0x9b   : > { %3741 = vst [vmem:[#allocation13_spill] sm:$0xff] %v2681_v13 }
  0x9c   : > { %v2695_v22 = vpop.permute.xlu0 %865 }
  0x9e   : > { %v2684_v6 = vpop.permute.xlu1 %885  ;;  %2267 = vset.pattern.permute.xlu1 %v2347_v14 }
  0x9f   : > { %1523 = vperm.xlu1 %2267, %v2526_v35  }
  0xa0   : > { %v2702_v25 = vpop.permute.xlu0 %880 }
  0xa2   : > { %v2687_v20 = vpop.permute.xlu1 %895 }
  0xa3   : > { %2268 = vset.pattern.permute.xlu1 %v2349_v18 }
  0xa4   : > { %1631 = vperm.xlu1 %2268, %v2445_v5   ;;  %v2707_v26 = vpop.permute.xlu0 %890 }
  0xa5   : > { %3746 = vst [vmem:[#allocation18_spill] sm:$0xff] %v2707_v26 }
  0xa7   : > { %v2692_v0 = vpop.permute.xlu1 %951 }
  0xa8   : > { %2270 = vset.pattern.permute.xlu1 %v2348_v15 }
  0xa9   : > { %1419 = vperm.xlu1 %2270, %v2553_v39  }
  0xab   : > { %v2697_v23 = vpop.permute.xlu1 %955 }
  0xac   : > { %3743 = vst [vmem:[#allocation15_spill] sm:$0xff] %v2697_v23 }
  0xad   : > { %2271 = vset.pattern.permute.xlu1 %v2347_v14 }
  0xae   : > { %1527 = vperm.xlu1 %2271, %v2469_v11  }
  0xaf   : > { %v2700_v24 = vpop.permute.xlu1 %963 }
  0xb0   : > { %3744 = vst [vmem:[#allocation16_spill] sm:$0xff] %v2700_v24 }
  0xb2   : > { %2272 = vset.pattern.permute.xlu1 %v2348_v15 }
  0xb3   : > { %v2704_v5 = vpop.permute.xlu1 %971  ;;  %1423 = vperm.xlu1 %2272, %v2517_v30   ;;  %v2715_v11 = vpop.permute.xlu0 %947 }
  0xb4   : > { %3745 = vst [vmem:[#allocation17_spill] sm:$0xff] %v2704_v5  ;;  %3749 = vst [vmem:[#allocation21_spill] sm:$0xff] %v2715_v11 }
  0xb7   : > { %2273 = vset.pattern.permute.xlu1 %v2347_v14  ;;  %v2720_v31 = vpop.permute.xlu0 %959 }
  0xb8   : > { %1531 = vperm.xlu1 %2273, %v2553_v39   ;;  %v2710_v27 = vpop.permute.xlu1 %1059  ;;  %3751 = vst [vmem:[#allocation23_spill] sm:$0xff] %v2720_v31 }
  0xb9   : > { %3747 = vst [vmem:[#allocation19_spill] sm:$0xff] %v2710_v27 }
  0xbb   : > { %v2726_v34 = vpop.permute.xlu0 %967 }
  0xbc   : > { %1535 = vperm.xlu1 %2273, %v2517_v30   ;;  %v2713_v28 = vpop.permute.xlu1 %1067 }
  0xbd   : > { %3748 = vst [vmem:[#allocation20_spill] sm:$0xff] %v2713_v28 }
  0xbf   : > { %v2730_v36 = vpop.permute.xlu0 %975 }
  0xc0   : > { %2274 = vset.pattern.permute.xlu1 %v2349_v18  ;;  %v2717_v29 = vpop.permute.xlu1 %1071 }
  0xc1   : > { %3750 = vst [vmem:[#allocation22_spill] sm:$0xff] %v2717_v29  ;;  %1647 = vperm.xlu1 %2274, %v2517_v30  }
  0xc4   : > { %v2722_v32 = vpop.permute.xlu1 %1079  ;;  %v2734_v38 = vpop.permute.xlu0 %1063 }
  0xc8   : > { %v2724_v33 = vpop.permute.xlu1 %1087  ;;  %v2740_v30 = vpop.permute.xlu0 %1075 }
  0xc9   : > { %3755 = vst [vmem:[#allocation27_spill] sm:$0xff] %v2740_v30 }
  0xcc   : > { %v2744_v42 = vpop.permute.xlu0 %1083 }
  0xcd   : > { %v2728_v35 = vpop.permute.xlu1 %1175  ;;  %3757 = vst [vmem:[#allocation29_spill] sm:$0xff] %v2744_v42 }
  0xd1   : > { %v2732_v37 = vpop.permute.xlu1 %1179  ;;  %v2748_v44 = vpop.permute.xlu0 %1171 }
  0xd2   : > { %3752 = vst [vmem:[#allocation24_spill] sm:$0xff] %v2732_v37  ;;  %3759 = vst [vmem:[#allocation31_spill] sm:$0xff] %v2748_v44 }
  0xd5   : > { %v2736_v39 = vpop.permute.xlu1 %1187  ;;  %v2752_v46 = vpop.permute.xlu0 %1183 }
  0xd6   : > { %3753 = vst [vmem:[#allocation25_spill] sm:$0xff] %v2736_v39  ;;  %3761 = vst [vmem:[#allocation33_spill] sm:$0xff] %v2752_v46 }
  0xd9   : > { %v2738_v40 = vpop.permute.xlu1 %1195  ;;  %v2756_v48 = vpop.permute.xlu0 %1191 }
  0xda   : > { %3754 = vst [vmem:[#allocation26_spill] sm:$0xff] %v2738_v40 }
  0xdd   : > { %v2760_v50 = vpop.permute.xlu0 %1199 }
  0xde   : > { %v2742_v41 = vpop.permute.xlu1 %1283 }
  0xdf   : > { %3756 = vst [vmem:[#allocation28_spill] sm:$0xff] %v2742_v41 }
  0xe2   : > { %v2746_v43 = vpop.permute.xlu1 %1291  ;;  %v2772_v56 = vpop.permute.xlu0 %1507 }
  0xe3   : > { %3758 = vst [vmem:[#allocation30_spill] sm:$0xff] %v2746_v43  ;;  %3767 = vst [vmem:[#allocation39_spill] sm:$0xff] %v2772_v56 }
  0xe6   : > { %v2806_v4 = vpop.permute.xlu0 %1519 }
  0xe7   : > { %v2750_v45 = vpop.permute.xlu1 %1395  ;;  %3775 = vst [vmem:[#allocation47_spill] sm:$0xff] %v2806_v4 }
  0xe8   : > { %3760 = vst [vmem:[#allocation32_spill] sm:$0xff] %v2750_v45 }
  0xeb   : > { %v2870_v40 = vpop.permute.xlu0 %1399 }
  0xec   : > { %v2754_v47 = vpop.permute.xlu1 %1295 }
  0xed   : > { %3762 = vst [vmem:[#allocation34_spill] sm:$0xff] %v2754_v47 }
  0xf1   : > { %v2758_v49 = vpop.permute.xlu1 %1403 }
  0xf2   : > { %3763 = vst [vmem:[#allocation35_spill] sm:$0xff] %v2758_v49 }
  0xf6   : > { %v2762_v51 = vpop.permute.xlu1 %1511 }
  0xf7   : > { %3764 = vst [vmem:[#allocation36_spill] sm:$0xff] %v2762_v51 }
  0xfb   : > { %v2764_v52 = vpop.f32.mrb[0].mxu0  ;;  %v2774_v57 = vpop.permute.xlu1 %1299 }
  0xfc   : > { %v2766_v53 = vpop.f32.mrb[0].mxu1  ;;  %v2768_v54 = vpop.f32.mrb[1].mxu0  ;;  %3768 = vst [vmem:[#allocation40_spill] sm:$0xff] %v2774_v57 }
  0xfd   : > { %3765 = vst [vmem:[#allocation37_spill] sm:$0xff] %v2768_v54  ;;  %v2770_v55 = vpop.f32.mrb[1].mxu1 }
  0xfe   : > { %3766 = vst [vmem:[#allocation38_spill] sm:$0xff] %v2770_v55 }
 0x100   : > { %v2776_v58 = vpop.f32.mrb[2].mxu0  ;;  %v2778_v59 = vpop.f32.mrb[2].mxu1 }
 0x101   : > { %3769 = vst [vmem:[#allocation41_spill] sm:$0xff] %v2776_v58  ;;  %3770 = vst [vmem:[#allocation42_spill] sm:$0xff] %v2778_v59  ;;  %v2780_v60 = vpop.f32.mrb[3].mxu0  ;;  %v2788_v63 = vpop.f32.mrb[3].mxu1 }
 0x102   : > { %3771 = vst [vmem:[#allocation43_spill] sm:$0xff] %v2780_v60  ;;  %3774 = vst [vmem:[#allocation46_spill] sm:$0xff] %v2788_v63  ;;  %v2824_v63 = vpop.permute.xlu1 %1515 }
 0x103   : > { %3776 = vst [vmem:[#allocation48_spill] sm:$0xff] %v2824_v63 }
 0x106   : > { %v782_v14 = vpop.f32.mrb[4].mxu0  ;;  %v853_v60 = vpop.f32.mrb[4].mxu1 }
 0x107   : > { %v2835_v3 = vrot.slane %v782_v14, %v2453_v7  ;;  %v2838_v12 = vrot.slane %v782_v14, %v2460_v9  ;;  %v2841_v59 = vrot.slane %v782_v14, %v2487_v16  ;;  %v2844_v15 = vrot.slane %v782_v14, %v2783_v61  ;;  %v784_v18 = vpop.f32.mrb[5].mxu0  ;;  %v855_v47 = vpop.f32.mrb[5].mxu1 }
 0x108   : > { %v2847_v58 = vrot.slane %v782_v14, %v2456_v8  ;;  %v2850_v1 = vrot.slane %v782_v14, %v2463_v10  ;;  %v2853_v2 = vrot.slane %v782_v14, %v2490_v17  ;;  %v2856_v4 = vrot.slane %v782_v14, %v2786_v62  ;;  %v2892_v28 = vpop.permute.xlu1 %1619 }
 0x109   : > { %v2859_v46 = vrot.slane %v853_v60, %v2453_v7  ;;  %v2862_v29 = vrot.slane %v853_v60, %v2460_v9  ;;  %v2865_v31 = vrot.slane %v853_v60, %v2487_v16  ;;  %v2868_v13 = vrot.slane %v853_v60, %v2783_v61  ;;  %3781 = vst [vmem:[#allocation53_spill] sm:$0xff] %v2892_v28 }
 0x10a   : > { %3777 = vst [vmem:[#allocation49_spill] sm:$0xff] %v2853_v2  ;;  %3778 = vst [vmem:[#allocation50_spill] sm:$0xff] %v2856_v4  ;;  %v2873_v42 = vrot.slane %v853_v60, %v2456_v8  ;;  %v2876_v14 = vrot.slane %v853_v60, %v2463_v10  ;;  %v2879_v5 = vrot.slane %v853_v60, %v2490_v17 }
 0x10b   : > { %v2882_v26 = vrot.slane %v853_v60, %v2786_v62  ;;  %v914_v63 = vmul.f32 %v2835_v3, %v2690_v21  ;;  %v916_v49 = vmul.f32 %v2859_v46, %v2690_v21  ;;  %v994_v43 = vmul.f32 %v2838_v12, %v2715_v11 }
 0x10c   : > { %3779 = vst [vmem:[#allocation51_spill] sm:$0xff] %v2879_v5  ;;  %v996_v37 = vmul.f32 %v2862_v29, %v2715_v11  ;;  %v1106_v23 = vmul.f32 %v2841_v59, %v2710_v27  ;;  %v1108_v60 = vmul.f32 %v2865_v31, %v2710_v27  ;;  %v1218_v55 = vmul.f32 %v2844_v15, %v2748_v44 }
 0x10d   : > { %3780 = vst [vmem:[#allocation52_spill] sm:$0xff] %v2882_v26  ;;  %v1220_v54 = vmul.f32 %v2868_v13, %v2748_v44  ;;  %v1026_v19 = vadd.f32 %v994_v43, %v914_v63  ;;  %v1330_v21 = vmul.f32 %v2847_v58, %v2742_v41  ;;  %v1332_v11 = vmul.f32 %v2873_v42, %v2742_v41  ;;  %v2918_v41 = vpop.permute.xlu0 %1407 }
 0x10e   : > { %v1028_v51 = vadd.f32 %v996_v37, %v916_v49  ;;  %v1442_v57 = vmul.f32 %v2850_v1, %v2750_v45  ;;  %v1444_v27 = vmul.f32 %v2876_v14, %v2750_v45  ;;  %v1554_v39 = vmul.f32 %v2853_v2, %v2772_v56  ;;  %3782 = vst [vmem:[#allocation54_spill] sm:$0xff] %v2918_v41 }
 0x10f   : > { %v1556_v44 = vmul.f32 %v2879_v5, %v2772_v56  ;;  %v1138_v43 = vadd.f32 %v1106_v23, %v1026_v19  ;;  %v1666_v49 = vmul.f32 %v2856_v4, %v2892_v28  ;;  %v1668_v63 = vmul.f32 %v2882_v26, %v2892_v28 }
 0x110   : > { %v1140_v37 = vadd.f32 %v1108_v60, %v1028_v51  ;;  %v2921_v30 = vrot.slane %v784_v18, %v2453_v7  ;;  %v2924_v45 = vrot.slane %v784_v18, %v2460_v9  ;;  %v2927_v2 = vrot.slane %v784_v18, %v2487_v16 }
 0x111   : > { %v2930_v19 = vrot.slane %v784_v18, %v2783_v61  ;;  %v1250_v23 = vadd.f32 %v1218_v55, %v1138_v43  ;;  %v2933_v60 = vrot.slane %v784_v18, %v2456_v8  ;;  %v2936_v26 = vrot.slane %v784_v18, %v2463_v10 }
 0x112   : > { %3783 = vst [vmem:[#allocation55_spill] sm:$0xff] %v2921_v30  ;;  %v1252_v51 = vadd.f32 %v1220_v54, %v1140_v37  ;;  %v2939_v41 = vrot.slane %v784_v18, %v2490_v17  ;;  %v2942_v4 = vrot.slane %v784_v18, %v2786_v62  ;;  %v2945_v28 = vrot.slane %v855_v47, %v2453_v7 }
 0x113   : > { %v2948_v5 = vrot.slane %v855_v47, %v2460_v9  ;;  %v1362_v55 = vadd.f32 %v1330_v21, %v1250_v23  ;;  %v2951_v43 = vrot.slane %v855_v47, %v2487_v16  ;;  %v2954_v37 = vrot.slane %v855_v47, %v2783_v61  ;;  %v2972_v61 = vpop.permute.xlu0 %1415 }
 0x114   : > { %3784 = vst [vmem:[#allocation56_spill] sm:$0xff] %v2939_v41  ;;  %3785 = vst [vmem:[#allocation57_spill] sm:$0xff] %v2942_v4  ;;  %v1364_v54 = vadd.f32 %v1332_v11, %v1252_v51  ;;  %v2957_v56 = vrot.slane %v855_v47, %v2456_v8  ;;  %v2960_v18 = vrot.slane %v855_v47, %v2463_v10 }
 0x115   : > { %v2963_v4 = vrot.slane %v855_v47, %v2490_v17  ;;  %v2966_v9 = vrot.slane %v855_v47, %v2786_v62  ;;  %v1474_v21 = vadd.f32 %v1442_v57, %v1362_v55  ;;  %v918_v23 = vmul.f32 %v2835_v3, %v2695_v22  ;;  %3788 = vst [vmem:[#allocation60_spill] sm:$0xff] %v2972_v61 }
 0x116   : > { %v1476_v11 = vadd.f32 %v1444_v27, %v1364_v54  ;;  %v919_v51 = vmul.f32 %v2921_v30, %v2695_v22  ;;  %v920_v10 = vmul.f32 %v2859_v46, %v2695_v22  ;;  %v921_v17 = vmul.f32 %v2945_v28, %v2695_v22 }
 0x117   : > { %3786 = vst [vmem:[#allocation58_spill] sm:$0xff] %v2963_v4  ;;  %3787 = vst [vmem:[#allocation59_spill] sm:$0xff] %v2966_v9  ;;  %v998_v47 = vmul.f32 %v2838_v12, %v2692_v0  ;;  %v999_v27 = vmul.f32 %v2924_v45, %v2692_v0  ;;  %v1586_v57 = vadd.f32 %v1554_v39, %v1474_v21 }
 0x118   : > { %v1588_v55 = vadd.f32 %v1556_v44, %v1476_v11  ;;  %v1000_v54 = vmul.f32 %v2862_v29, %v2692_v0  ;;  %v1001_v62 = vmul.f32 %v2948_v5, %v2692_v0  ;;  %v1110_v16 = vmul.f32 %v2841_v59, %v2734_v38 }
 0x119   : > { %v1030_v61 = vadd.f32 %v998_v47, %v918_v23  ;;  %v1031_v8 = vadd.f32 %v999_v27, %v919_v51  ;;  %v1111_v22 = vmul.f32 %v2927_v2, %v2734_v38  ;;  %v1698_v9 = vadd.f32 %v1666_v49, %v1586_v57 }
 0x11a   : > { %v1700_v4 = vadd.f32 %v1668_v63, %v1588_v55  ;;  %v1032_v41 = vadd.f32 %v1000_v54, %v920_v10  ;;  %v1033_v24 = vadd.f32 %v1001_v62, %v921_v17  ;;  %v1112_v39 = vmul.f32 %v2865_v31, %v2734_v38  ;;  %v1288_v62 = vpop.permute.xlu0 %1287 }
 0x11b   : > { %v1113_v44 = vmul.f32 %v2951_v43, %v2734_v38  ;;  %v1142_v21 = vadd.f32 %v1110_v16, %v1030_v61  ;;  %v1143_v0 = vadd.f32 %v1111_v22, %v1031_v8  ;;  %v3789_v11 = vrot.slane %v2764_v52, %v2453_v7 }
 0x11c   : > { %v3790_v51 = vrot.slane %v2766_v53, %v2453_v7  ;;  %v1222_v10 = vmul.f32 %v2844_v15, %v2728_v35  ;;  %v1223_v17 = vmul.f32 %v2930_v19, %v2728_v35  ;;  %v1144_v38 = vadd.f32 %v1112_v39, %v1032_v41 }
 0x11d   : > { %v2997_v23 = vmul.f32 %v3789_v11, %v1698_v9  ;;  %v1145_v16 = vadd.f32 %v1113_v44, %v1033_v24  ;;  %v1224_v8 = vmul.f32 %v2868_v13, %v2728_v35  ;;  %v1225_v9 = vmul.f32 %v2954_v37, %v2728_v35 }
 0x11e   : > { %v3002_v49 = vmul.f32 %v3790_v51, %v1700_v4  ;;  %v1254_v61 = vadd.f32 %v1222_v10, %v1142_v21  ;;  %v1255_v63 = vadd.f32 %v1223_v17, %v1143_v0  ;;  %v1334_v4 = vmul.f32 %v2847_v58, %v1288_v62 }
 0x11f   : > { %v1335_v47 = vmul.f32 %v2933_v60, %v1288_v62  ;;  %v1256_v27 = vadd.f32 %v1224_v8, %v1144_v38  ;;  %v1257_v57 = vadd.f32 %v1225_v9, %v1145_v16  ;;  %v1336_v55 = vmul.f32 %v2873_v42, %v1288_v62 }
 0x120   : > { %v1337_v54 = vmul.f32 %v2957_v56, %v1288_v62  ;;  %v1366_v41 = vadd.f32 %v1334_v4, %v1254_v61  ;;  %v1446_v22 = vmul.f32 %v2850_v1, %v2870_v40  ;;  %v1447_v35 = vmul.f32 %v2936_v26, %v2870_v40 }
 0x121   : > { %v1367_v24 = vadd.f32 %v1335_v47, %v1255_v63  ;;  %v1368_v39 = vadd.f32 %v1336_v55, %v1256_v27  ;;  %v1448_v21 = vmul.f32 %v2876_v14, %v2870_v40  ;;  %v1449_v0 = vmul.f32 %v2960_v18, %v2870_v40 }
 0x122   : > { %v1369_v44 = vadd.f32 %v1337_v54, %v1257_v57  ;;  %v3024_v11 = vadd.f32 %v1446_v22, %v1366_v41  ;;  %v934_v10 = vmul.f32 %v2835_v3, %v2684_v6  ;;  %v935_v17 = vmul.f32 %v2921_v30, %v2684_v6  ;;  %v1304_v57 = vpop.permute.xlu1 %1303 }
 0x123   : > { %v3026_v51 = vadd.f32 %v1447_v35, %v1367_v24  ;;  %v3032_v62 = vadd.f32 %v1448_v21, %v1368_v39  ;;  %v936_v16 = vmul.f32 %v2859_v46, %v2684_v6  ;;  %v937_v40 = vmul.f32 %v2945_v28, %v2684_v6 }
 0x124   : > { %v3034_v38 = vadd.f32 %v1449_v0, %v1369_v44  ;;  %v1014_v8 = vmul.f32 %v2838_v12, %v2726_v34  ;;  %v1015_v9 = vmul.f32 %v2924_v45, %v2726_v34  ;;  %v1016_v61 = vmul.f32 %v2862_v29, %v2726_v34 }
 0x125   : > { %v1017_v63 = vmul.f32 %v2948_v5, %v2726_v34  ;;  %v1126_v4 = vmul.f32 %v2841_v59, %v2722_v32  ;;  %v1127_v47 = vmul.f32 %v2927_v2, %v2722_v32  ;;  %v1128_v6 = vmul.f32 %v2865_v31, %v2722_v32 }
 0x126   : > { %v1129_v27 = vmul.f32 %v2951_v43, %v2722_v32  ;;  %v1046_v55 = vadd.f32 %v1014_v8, %v934_v10  ;;  %v1047_v54 = vadd.f32 %v1015_v9, %v935_v17  ;;  %v1048_v41 = vadd.f32 %v1016_v61, %v936_v16 }
 0x127   : > { %v1049_v24 = vadd.f32 %v1017_v63, %v937_v40  ;;  %v1238_v34 = vmul.f32 %v2844_v15, %v2756_v48  ;;  %v1239_v22 = vmul.f32 %v2930_v19, %v2756_v48  ;;  %v1240_v35 = vmul.f32 %v2868_v13, %v2756_v48 }
 0x128   : > { %v1241_v39 = vmul.f32 %v2954_v37, %v2756_v48  ;;  %v1158_v44 = vadd.f32 %v1126_v4, %v1046_v55  ;;  %v1159_v21 = vadd.f32 %v1127_v47, %v1047_v54  ;;  %v1160_v32 = vadd.f32 %v1128_v6, %v1048_v41 }
 0x129   : > { %v1161_v0 = vadd.f32 %v1129_v27, %v1049_v24  ;;  %v1350_v10 = vmul.f32 %v2847_v58, %v1304_v57  ;;  %v1351_v17 = vmul.f32 %v2933_v60, %v1304_v57  ;;  %v1352_v16 = vmul.f32 %v2873_v42, %v1304_v57 }
 0x12a   : > { %v1353_v40 = vmul.f32 %v2957_v56, %v1304_v57  ;;  %v1270_v8 = vadd.f32 %v1238_v34, %v1158_v44  ;;  %v1271_v9 = vadd.f32 %v1239_v22, %v1159_v21  ;;  %v1272_v61 = vadd.f32 %v1240_v35, %v1160_v32  ;;  %v1312_v44 = vpop.permute.xlu0 %1311 }
 0x12b   : > { %v1273_v63 = vadd.f32 %v1241_v39, %v1161_v0  ;;  %v942_v7 = vmul.f32 %v2835_v3, %v2687_v20  ;;  %v943_v48 = vmul.f32 %v2921_v30, %v2687_v20  ;;  %v944_v4 = vmul.f32 %v2859_v46, %v2687_v20 }
 0x12c   : > { %v945_v47 = vmul.f32 %v2945_v28, %v2687_v20  ;;  %v3076_v6 = vadd.f32 %v1350_v10, %v1270_v8  ;;  %v3078_v27 = vadd.f32 %v1351_v17, %v1271_v9  ;;  %v3080_v57 = vadd.f32 %v1352_v16, %v1272_v61 }
 0x12d   : > { %v3082_v55 = vadd.f32 %v1353_v40, %v1273_v63  ;;  %v1022_v54 = vmul.f32 %v2838_v12, %v2730_v36  ;;  %v1023_v41 = vmul.f32 %v2924_v45, %v2730_v36  ;;  %v1024_v24 = vmul.f32 %v2862_v29, %v2730_v36 }
 0x12e   : > { %3791 = vst [vmem:[#allocation61_spill] sm:$0xff] %v3076_v6  ;;  %3792 = vst [vmem:[#allocation62_spill] sm:$0xff] %v3078_v27  ;;  %v1025_v20 = vmul.f32 %v2948_v5, %v2730_v36  ;;  %v1134_v34 = vmul.f32 %v2841_v59, %v2724_v33  ;;  %v1135_v22 = vmul.f32 %v2927_v2, %v2724_v33  ;;  %v3821_v6 = vld [vmem:[#allocation59_spill] sm:$0xff] }
 0x12f   : > { %3793 = vst [vmem:[#allocation63_spill] sm:$0xff] %v3080_v57  ;;  %3794 = vst [vmem:[#allocation64_spill] sm:$0xff] %v3082_v55  ;;  %v1136_v35 = vmul.f32 %v2865_v31, %v2724_v33  ;;  %v1137_v39 = vmul.f32 %v2951_v43, %v2724_v33  ;;  %v1054_v21 = vadd.f32 %v1022_v54, %v942_v7  ;;  %v3820_v57 = vld [vmem:[#allocation57_spill] sm:$0xff] }
 0x130   : > { %v1055_v32 = vadd.f32 %v1023_v41, %v943_v48  ;;  %v1056_v0 = vadd.f32 %v1024_v24, %v944_v4  ;;  %v1057_v10 = vadd.f32 %v1025_v20, %v945_v47  ;;  %v1246_v36 = vmul.f32 %v2844_v15, %v2760_v50 }
 0x131   : > { %v1247_v17 = vmul.f32 %v2930_v19, %v2760_v50  ;;  %v1248_v16 = vmul.f32 %v2868_v13, %v2760_v50  ;;  %v1249_v40 = vmul.f32 %v2954_v37, %v2760_v50  ;;  %v1166_v8 = vadd.f32 %v1134_v34, %v1054_v21 }
 0x132   : > { %v1167_v9 = vadd.f32 %v1135_v22, %v1055_v32  ;;  %v1168_v33 = vadd.f32 %v1136_v35, %v1056_v0  ;;  %v1169_v61 = vadd.f32 %v1137_v39, %v1057_v10  ;;  %v1358_v7 = vmul.f32 %v2847_v58, %v1312_v44  ;;  %v3799_v32 = vld [vmem:[#allocation16_spill] sm:$0xff] }
 0x133   : > { %v1359_v63 = vmul.f32 %v2933_v60, %v1312_v44  ;;  %v1360_v48 = vmul.f32 %v2873_v42, %v1312_v44  ;;  %v1361_v4 = vmul.f32 %v2957_v56, %v1312_v44  ;;  %v1278_v47 = vadd.f32 %v1246_v36, %v1166_v8 }
 0x134   : > { %v1279_v54 = vadd.f32 %v1247_v17, %v1167_v9  ;;  %v1280_v41 = vadd.f32 %v1248_v16, %v1168_v33  ;;  %v1281_v24 = vadd.f32 %v1249_v40, %v1169_v61  ;;  %v930_v20 = vmul.f32 %v2835_v3, %v2702_v25  ;;  %v3800_v17 = vld [vmem:[#allocation27_spill] sm:$0xff] }
 0x135   : > { %v931_v50 = vmul.f32 %v2921_v30, %v2702_v25  ;;  %v932_v34 = vmul.f32 %v2859_v46, %v2702_v25  ;;  %v933_v22 = vmul.f32 %v2945_v28, %v2702_v25  ;;  %v3120_v35 = vadd.f32 %v1358_v7, %v1278_v47 }
 0x136   : > { %v3122_v39 = vadd.f32 %v1359_v63, %v1279_v54  ;;  %v3124_v44 = vadd.f32 %v1360_v48, %v1280_v41  ;;  %v3126_v21 = vadd.f32 %v1361_v4, %v1281_v24  ;;  %v1010_v0 = vmul.f32 %v2838_v12, %v3799_v32  ;;  %v3801_v48 = vld [vmem:[#allocation25_spill] sm:$0xff]  ;;  %v1412_v24 = vpop.permute.xlu1 %1411 }
 0x137   : > { %3795 = vst [vmem:[#allocation65_spill] sm:$0xff] %v3120_v35  ;;  %v1011_v10 = vmul.f32 %v2924_v45, %v3799_v32  ;;  %v1012_v36 = vmul.f32 %v2862_v29, %v3799_v32  ;;  %v1013_v25 = vmul.f32 %v2948_v5, %v3799_v32  ;;  %v1122_v16 = vmul.f32 %v2841_v59, %v3800_v17 }
 0x138   : > { %3796 = vst [vmem:[#allocation66_spill] sm:$0xff] %v3122_v39  ;;  %3797 = vst [vmem:[#allocation67_spill] sm:$0xff] %v3124_v44  ;;  %v1123_v40 = vmul.f32 %v2927_v2, %v3800_v17  ;;  %v1124_v8 = vmul.f32 %v2865_v31, %v3800_v17  ;;  %v1125_v9 = vmul.f32 %v2951_v43, %v3800_v17  ;;  %v3803_v39 = vld [vmem:[#allocation14_spill] sm:$0xff] }
 0x139   : > { %3798 = vst [vmem:[#allocation68_spill] sm:$0xff] %v3126_v21  ;;  %v1042_v33 = vadd.f32 %v1010_v0, %v930_v20  ;;  %v1043_v61 = vadd.f32 %v1011_v10, %v931_v50  ;;  %v1044_v7 = vadd.f32 %v1012_v36, %v932_v34  ;;  %v1045_v63 = vadd.f32 %v1013_v25, %v933_v22  ;;  %v3802_v50 = vld [vmem:[#allocation40_spill] sm:$0xff] }
 0x13a   : > { %v1234_v4 = vmul.f32 %v2844_v15, %v3801_v48  ;;  %v1235_v47 = vmul.f32 %v2930_v19, %v3801_v48  ;;  %v1236_v54 = vmul.f32 %v2868_v13, %v3801_v48  ;;  %v1237_v41 = vmul.f32 %v2954_v37, %v3801_v48 }
 0x13b   : > { %v1154_v32 = vadd.f32 %v1122_v16, %v1042_v33  ;;  %v1155_v21 = vadd.f32 %v1123_v40, %v1043_v61  ;;  %v1156_v17 = vadd.f32 %v1124_v8, %v1044_v7  ;;  %v1157_v20 = vadd.f32 %v1125_v9, %v1045_v63 }
 0x13c   : > { %v1346_v34 = vmul.f32 %v2847_v58, %v3802_v50  ;;  %v1347_v22 = vmul.f32 %v2933_v60, %v3802_v50  ;;  %v1348_v0 = vmul.f32 %v2873_v42, %v3802_v50  ;;  %v1349_v10 = vmul.f32 %v2957_v56, %v3802_v50  ;;  %v3809_v50 = vld [vmem:[#allocation19_spill] sm:$0xff] }
 0x13d   : > { %v1266_v36 = vadd.f32 %v1234_v4, %v1154_v32  ;;  %v1267_v25 = vadd.f32 %v1235_v47, %v1155_v21  ;;  %v1268_v48 = vadd.f32 %v1236_v54, %v1156_v17  ;;  %v1269_v44 = vadd.f32 %v1237_v41, %v1157_v20  ;;  %v3804_v4 = vld [vmem:[#allocation21_spill] sm:$0xff] }
 0x13e   : > { %v1458_v16 = vmul.f32 %v2850_v1, %v1412_v24  ;;  %v1459_v40 = vmul.f32 %v2936_v26, %v1412_v24  ;;  %v1460_v8 = vmul.f32 %v2876_v14, %v1412_v24  ;;  %v1461_v9 = vmul.f32 %v2960_v18, %v1412_v24 }
 0x13f   : > { %v1378_v33 = vadd.f32 %v1346_v34, %v1266_v36  ;;  %v1379_v61 = vadd.f32 %v1347_v22, %v1267_v25  ;;  %v1380_v7 = vadd.f32 %v1348_v0, %v1268_v48  ;;  %v1381_v63 = vadd.f32 %v1349_v10, %v1269_v44  ;;  %v3810_v22 = vld [vmem:[#allocation31_spill] sm:$0xff]  ;;  %v3811_v36 = vld [vmem:[#allocation28_spill] sm:$0xff] }
 0x140   : > { %v915_v35 = vmul.f32 %v2921_v30, %v3803_v39  ;;  %v917_v21 = vmul.f32 %v2945_v28, %v3803_v39  ;;  %v995_v47 = vmul.f32 %v2924_v45, %v3804_v4  ;;  %v997_v54 = vmul.f32 %v2948_v5, %v3804_v4  ;;  %v3816_v4 = vld [vmem:[#allocation36_spill] sm:$0xff] }
 0x141   : > { %v3172_v41 = vadd.f32 %v1458_v16, %v1378_v33  ;;  %v3174_v32 = vadd.f32 %v1459_v40, %v1379_v61  ;;  %v3176_v24 = vadd.f32 %v1460_v8, %v1380_v7  ;;  %v3178_v17 = vadd.f32 %v1461_v9, %v1381_v63  ;;  %v3812_v40 = vld [vmem:[#allocation32_spill] sm:$0xff]  ;;  %v3813_v33 = vld [vmem:[#allocation39_spill] sm:$0xff]  ;;  %v3815_v63 = vld [vmem:[#allocation58_spill] sm:$0xff] }
 0x142   : > { %v1027_v44 = vadd.f32 %v995_v47, %v915_v35  ;;  %v1029_v20 = vadd.f32 %v997_v54, %v917_v21  ;;  %v1107_v34 = vmul.f32 %v2927_v2, %v3809_v50  ;;  %v1109_v39 = vmul.f32 %v2951_v43, %v3809_v50  ;;  %v3814_v61 = vld [vmem:[#allocation56_spill] sm:$0xff]  ;;  %v3817_v47 = vld [vmem:[#allocation49_spill] sm:$0xff] }
 0x143   : > { %3805 = vst [vmem:[#allocation16_spill] sm:$0xff] %v3172_v41  ;;  %3806 = vst [vmem:[#allocation27_spill] sm:$0xff] %v3174_v32  ;;  %v1219_v0 = vmul.f32 %v2930_v19, %v3810_v22  ;;  %v1221_v10 = vmul.f32 %v2954_v37, %v3810_v22  ;;  %v1331_v25 = vmul.f32 %v2933_v60, %v3811_v36  ;;  %v3823_v41 = vld [vmem:[#allocation52_spill] sm:$0xff] }
 0x144   : > { %3807 = vst [vmem:[#allocation25_spill] sm:$0xff] %v3176_v24  ;;  %3808 = vst [vmem:[#allocation40_spill] sm:$0xff] %v3178_v17  ;;  %v1333_v48 = vmul.f32 %v2957_v56, %v3811_v36  ;;  %v1139_v35 = vadd.f32 %v1107_v34, %v1027_v44  ;;  %v1141_v16 = vadd.f32 %v1109_v39, %v1029_v20  ;;  %v1624_v44 = vpop.permute.xlu0 %1623  ;;  %v3818_v39 = vld [vmem:[#allocation51_spill] sm:$0xff] }
 0x145   : > { %v1443_v8 = vmul.f32 %v2936_v26, %v3812_v40  ;;  %v1445_v9 = vmul.f32 %v2960_v18, %v3812_v40  ;;  %v1555_v7 = vmul.f32 %v3814_v61, %v3813_v33  ;;  %v1557_v21 = vmul.f32 %v3815_v63, %v3813_v33  ;;  %v3819_v33 = vld [vmem:[#allocation53_spill] sm:$0xff] }
 0x146   : > { %v1558_v54 = vmul.f32 %v3817_v47, %v3816_v4  ;;  %v1559_v50 = vmul.f32 %v3814_v61, %v3816_v4  ;;  %v1251_v20 = vadd.f32 %v1219_v0, %v1139_v35  ;;  %v1253_v34 = vadd.f32 %v1221_v10, %v1141_v16  ;;  %v3822_v35 = vld [vmem:[#allocation50_spill] sm:$0xff] }
 0x147   : > { %v1560_v22 = vmul.f32 %v3818_v39, %v3816_v4  ;;  %v1561_v36 = vmul.f32 %v3815_v63, %v3816_v4  ;;  %v1667_v27 = vmul.f32 %v3820_v57, %v3819_v33  ;;  %v1669_v17 = vmul.f32 %v3821_v6, %v3819_v33  ;;  %v3824_v63 = vld [vmem:[#allocation12_spill] sm:$0xff] }
 0x148   : > { %v1590_v40 = vadd.f32 %v1558_v54, %v3024_v11  ;;  %v1591_v55 = vadd.f32 %v1559_v50, %v3026_v51  ;;  %v1363_v24 = vadd.f32 %v1331_v25, %v1251_v20  ;;  %v1365_v32 = vadd.f32 %v1333_v48, %v1253_v34 }
 0x149   : > { %v1592_v0 = vadd.f32 %v1560_v22, %v3032_v62  ;;  %v1593_v10 = vadd.f32 %v1561_v36, %v3034_v38  ;;  %v1670_v16 = vmul.f32 %v3822_v35, %v1624_v44  ;;  %v1671_v4 = vmul.f32 %v3820_v57, %v1624_v44 }
 0x14a   : > { %v1672_v11 = vmul.f32 %v3823_v41, %v1624_v44  ;;  %v1673_v51 = vmul.f32 %v3821_v6, %v1624_v44  ;;  %v1475_v54 = vadd.f32 %v1443_v8, %v1363_v24  ;;  %v1477_v50 = vadd.f32 %v1445_v9, %v1365_v32  ;;  %v3825_v32 = vld [vmem:[#allocation8_spill] sm:$0xff]  ;;  %v3827_v9 = vld [vmem:[#allocation37_spill] sm:$0xff] }
 0x14b   : > { %v922_v39 = vmul.f32 %v2835_v3, %v3824_v63  ;;  %v923_v25 = vmul.f32 %v2921_v30, %v3824_v63  ;;  %v1702_v48 = vadd.f32 %v1670_v16, %v1590_v40  ;;  %v1703_v62 = vadd.f32 %v1671_v4, %v1591_v55  ;;  %v3832_v4 = vld [vmem:[#allocation15_spill] sm:$0xff] }
 0x14c   : > { %v1704_v20 = vadd.f32 %v1672_v11, %v1592_v0  ;;  %v1705_v38 = vadd.f32 %v1673_v51, %v1593_v10  ;;  %v1587_v34 = vadd.f32 %v1555_v7, %v1475_v54  ;;  %v1589_v22 = vadd.f32 %v1557_v21, %v1477_v50  ;;  %v3830_v7 = vld [vmem:[#allocation38_spill] sm:$0xff] }
 0x14d   : > { %v924_v36 = vmul.f32 %v2859_v46, %v3824_v63  ;;  %v925_v44 = vmul.f32 %v2945_v28, %v3824_v63  ;;  %v3826_v24 = vrot.slane %v2764_v52, %v3825_v32  ;;  %v3828_v33 = vrot.slane %v3827_v9, %v3825_v32 }
 0x14e   : > { %v3829_v55 = vrot.slane %v2766_v53, %v3825_v32  ;;  %v3831_v21 = vrot.slane %v3830_v7, %v3825_v32  ;;  %v1699_v10 = vadd.f32 %v1667_v27, %v1587_v34  ;;  %v1701_v16 = vadd.f32 %v1669_v17, %v1589_v22  ;;  %v3833_v27 = vld [vmem:[#allocation6_spill] sm:$0xff] }
 0x14f   : > { %v1766_v8 = vmul.f32 %v3826_v24, %v1702_v48  ;;  %v1767_v30 = vmul.f32 %v3828_v33, %v1703_v62  ;;  %v1002_v63 = vmul.f32 %v2838_v12, %v3832_v4  ;;  %v1003_v11 = vmul.f32 %v2924_v45, %v3832_v4 }
 0x150   : > { %v1768_v40 = vmul.f32 %v3829_v55, %v1704_v20  ;;  %v1769_v0 = vmul.f32 %v3831_v21, %v1705_v38  ;;  %v1004_v50 = vmul.f32 %v2862_v29, %v3832_v4  ;;  %v1005_v48 = vmul.f32 %v2948_v5, %v3832_v4 }
 0x151   : > { %v3245_v51 = vadd.f32 %v1766_v8, %v2997_v23  ;;  %v3834_v17 = vrot.slane %v3827_v9, %v3833_v27  ;;  %v3835_v20 = vrot.slane %v3830_v7, %v3833_v27  ;;  %v1034_v34 = vadd.f32 %v1002_v63, %v922_v39 }
 0x152   : > { %v3248_v54 = vadd.f32 %v1768_v40, %v3002_v49  ;;  %v1035_v23 = vadd.f32 %v1003_v11, %v923_v25  ;;  %v1036_v22 = vadd.f32 %v1004_v50, %v924_v36  ;;  %v1037_v32 = vadd.f32 %v1005_v48, %v925_v44  ;;  %v3836_v49 = vld [vmem:[#allocation20_spill] sm:$0xff]  ;;  %v3838_v50 = vld [vmem:[#allocation30_spill] sm:$0xff] }
 0x153   : > { %v1747_v62 = vmul.f32 %v3834_v17, %v1699_v10  ;;  %v1749_v38 = vmul.f32 %v3835_v20, %v1701_v16  ;;  %v1114_v24 = vmul.f32 %v2841_v59, %v3836_v49  ;;  %v1115_v8 = vmul.f32 %v2927_v2, %v3836_v49  ;;  %v3837_v36 = vld [vmem:[#allocation24_spill] sm:$0xff] }
 0x154   : > { %v1116_v40 = vmul.f32 %v2865_v31, %v3836_v49  ;;  %v1117_v21 = vmul.f32 %v2951_v43, %v3836_v49  ;;  %v1226_v44 = vmul.f32 %v2844_v15, %v3837_v36  ;;  %v1227_v10 = vmul.f32 %v2930_v19, %v3837_v36 }
 0x155   : > { %v3264_v33 = vadd.f32 %v1767_v30, %v1747_v62  ;;  %v3266_v55 = vadd.f32 %v1769_v0, %v1749_v38  ;;  %v1146_v39 = vadd.f32 %v1114_v24, %v1034_v34  ;;  %v1147_v25 = vadd.f32 %v1115_v8, %v1035_v23  ;;  %v1628_v24 = vpop.permute.xlu1 %1627 }
 0x156   : > { %v1148_v16 = vadd.f32 %v1116_v40, %v1036_v22  ;;  %v1149_v4 = vadd.f32 %v1117_v21, %v1037_v32  ;;  %v1228_v30 = vmul.f32 %v2868_v13, %v3837_v36  ;;  %v1229_v0 = vmul.f32 %v2954_v37, %v3837_v36  ;;  %v3839_v22 = vld [vmem:[#allocation35_spill] sm:$0xff] }
 0x157   : > { %v1258_v63 = vadd.f32 %v1226_v44, %v1146_v39  ;;  %v1259_v11 = vadd.f32 %v1227_v10, %v1147_v25  ;;  %v1338_v48 = vmul.f32 %v2847_v58, %v3838_v50  ;;  %v1339_v27 = vmul.f32 %v2933_v60, %v3838_v50  ;;  %v3840_v44 = vld [vmem:[#allocation48_spill] sm:$0xff] }
 0x158   : > { %v1260_v17 = vadd.f32 %v1228_v30, %v1148_v16  ;;  %v1261_v62 = vadd.f32 %v1229_v0, %v1149_v4  ;;  %v1340_v20 = vmul.f32 %v2873_v42, %v3838_v50  ;;  %v1341_v38 = vmul.f32 %v2957_v56, %v3838_v50  ;;  %v3841_v0 = vld [vmem:[#allocation51_spill] sm:$0xff] }
 0x159   : > { %v1370_v34 = vadd.f32 %v1338_v48, %v1258_v63  ;;  %v1371_v23 = vadd.f32 %v1339_v27, %v1259_v11  ;;  %v1450_v32 = vmul.f32 %v2850_v1, %v3839_v22  ;;  %v1451_v49 = vmul.f32 %v2936_v26, %v3839_v22  ;;  %v3842_v11 = vld [vmem:[#allocation58_spill] sm:$0xff] }
 0x15a   : > { %v1372_v8 = vadd.f32 %v1340_v20, %v1260_v17  ;;  %v1373_v40 = vadd.f32 %v1341_v38, %v1261_v62  ;;  %v1452_v21 = vmul.f32 %v2876_v14, %v3839_v22  ;;  %v1453_v39 = vmul.f32 %v2960_v18, %v3839_v22 }
 0x15b   : > { %v1482_v25 = vadd.f32 %v1450_v32, %v1370_v34  ;;  %v1483_v36 = vadd.f32 %v1451_v49, %v1371_v23  ;;  %v1562_v10 = vmul.f32 %v3817_v47, %v3840_v44  ;;  %v1563_v16 = vmul.f32 %v3814_v61, %v3840_v44  ;;  %v3843_v49 = vld [vmem:[#allocation18_spill] sm:$0xff] }
 0x15c   : > { %v1484_v4 = vadd.f32 %v1452_v21, %v1372_v8  ;;  %v1485_v30 = vadd.f32 %v1453_v39, %v1373_v40  ;;  %v1564_v63 = vmul.f32 %v3841_v0, %v3840_v44  ;;  %v1565_v50 = vmul.f32 %v3842_v11, %v3840_v44  ;;  %v3844_v40 = vld [vmem:[#allocation55_spill] sm:$0xff] }
 0x15d   : > { %v1594_v48 = vadd.f32 %v1562_v10, %v1482_v25  ;;  %v1595_v27 = vadd.f32 %v1563_v16, %v1483_v36  ;;  %v1674_v17 = vmul.f32 %v3822_v35, %v1628_v24  ;;  %v1675_v62 = vmul.f32 %v3820_v57, %v1628_v24  ;;  %v3845_v10 = vld [vmem:[#allocation10_spill] sm:$0xff] }
 0x15e   : > { %v1596_v20 = vadd.f32 %v1564_v63, %v1484_v4  ;;  %v1597_v38 = vadd.f32 %v1565_v50, %v1485_v30  ;;  %v1676_v34 = vmul.f32 %v3823_v41, %v1628_v24  ;;  %v1677_v23 = vmul.f32 %v3821_v6, %v1628_v24  ;;  %v1308_v63 = vpop.permute.xlu1 %1307  ;;  %v3848_v50 = vld [vmem:[#allocation17_spill] sm:$0xff] }
 0x15f   : > { %v1706_v22 = vadd.f32 %v1674_v17, %v1594_v48  ;;  %v1707_v32 = vadd.f32 %v1675_v62, %v1595_v27  ;;  %v938_v8 = vmul.f32 %v2835_v3, %v3843_v49  ;;  %v939_v21 = vmul.f32 %v3844_v40, %v3843_v49 }
 0x160   : > { %v1708_v39 = vadd.f32 %v1676_v34, %v1596_v20  ;;  %v1709_v25 = vadd.f32 %v1677_v23, %v1597_v38  ;;  %v940_v36 = vmul.f32 %v2859_v46, %v3843_v49  ;;  %v941_v44 = vmul.f32 %v2945_v28, %v3843_v49 }
 0x161   : > { %v3846_v16 = vrot.slane %v2764_v52, %v3845_v10  ;;  %v3847_v4 = vrot.slane %v3827_v9, %v3845_v10  ;;  %v1018_v48 = vmul.f32 %v2838_v12, %v3848_v50  ;;  %v1019_v27 = vmul.f32 %v2924_v45, %v3848_v50 }
 0x162   : > { %v3849_v17 = vrot.slane %v2766_v53, %v3845_v10  ;;  %v3850_v20 = vrot.slane %v3830_v7, %v3845_v10  ;;  %v1020_v34 = vmul.f32 %v2862_v29, %v3848_v50  ;;  %v1021_v23 = vmul.f32 %v2948_v5, %v3848_v50 }
 0x163   : > { %v1790_v24 = vmul.f32 %v3846_v16, %v1706_v22  ;;  %v1791_v30 = vmul.f32 %v3847_v4, %v1707_v32  ;;  %v1050_v49 = vadd.f32 %v1018_v48, %v938_v8  ;;  %v1051_v16 = vadd.f32 %v1019_v27, %v939_v21  ;;  %v3856_v21 = vld [vmem:[#allocation26_spill] sm:$0xff]  ;;  %v1524_v27 = vpop.permute.xlu1 %1523 }
 0x164   : > { %v1792_v62 = vmul.f32 %v3849_v17, %v1708_v39  ;;  %v1793_v38 = vmul.f32 %v3850_v20, %v1709_v25  ;;  %v1052_v25 = vadd.f32 %v1020_v34, %v940_v36  ;;  %v1053_v4 = vadd.f32 %v1021_v23, %v941_v44  ;;  %v3855_v17 = vld [vmem:[#allocation29_spill] sm:$0xff] }
 0x165   : > { %v3337_v22 = vadd.f32 %v1790_v24, %v3245_v51  ;;  %v3340_v32 = vadd.f32 %v1791_v30, %v3264_v33  ;;  %v1130_v20 = vmul.f32 %v2841_v59, %v3855_v17  ;;  %v1131_v51 = vmul.f32 %v2927_v2, %v3855_v17 }
 0x166   : > { %v3343_v39 = vadd.f32 %v1792_v62, %v3248_v54  ;;  %v3346_v10 = vadd.f32 %v1793_v38, %v3266_v55  ;;  %v1132_v33 = vmul.f32 %v2865_v31, %v3855_v17  ;;  %v1133_v8 = vmul.f32 %v2951_v43, %v3855_v17 }
 0x167   : > { %3851 = vst [vmem:[#allocation14_spill] sm:$0xff] %v3337_v22  ;;  %3852 = vst [vmem:[#allocation21_spill] sm:$0xff] %v3340_v32  ;;  %v1242_v54 = vmul.f32 %v2844_v15, %v3856_v21  ;;  %v1243_v55 = vmul.f32 %v2930_v19, %v3856_v21  ;;  %v1244_v36 = vmul.f32 %v2868_v13, %v3856_v21 }
 0x168   : > { %3853 = vst [vmem:[#allocation19_spill] sm:$0xff] %v3343_v39  ;;  %3854 = vst [vmem:[#allocation31_spill] sm:$0xff] %v3346_v10  ;;  %v1245_v44 = vmul.f32 %v2954_v37, %v3856_v21  ;;  %v1162_v24 = vadd.f32 %v1130_v20, %v1050_v49  ;;  %v1163_v30 = vadd.f32 %v1131_v51, %v1051_v16 }
 0x169   : > { %v1164_v50 = vadd.f32 %v1132_v33, %v1052_v25  ;;  %v1165_v48 = vadd.f32 %v1133_v8, %v1053_v4  ;;  %v1354_v62 = vmul.f32 %v2847_v58, %v1308_v63  ;;  %v1355_v38 = vmul.f32 %v2933_v60, %v1308_v63  ;;  %v1636_v4 = vpop.permute.xlu0 %1635  ;;  %v3857_v8 = vld [vmem:[#allocation16_spill] sm:$0xff] }
 0x16a   : > { %v1356_v34 = vmul.f32 %v2873_v42, %v1308_v63  ;;  %v1357_v23 = vmul.f32 %v2957_v56, %v1308_v63  ;;  %v1274_v17 = vadd.f32 %v1242_v54, %v1162_v24  ;;  %v1275_v10 = vadd.f32 %v1243_v55, %v1163_v30  ;;  %v3858_v54 = vld [vmem:[#allocation27_spill] sm:$0xff]  ;;  %v3860_v24 = vld [vmem:[#allocation40_spill] sm:$0xff] }
 0x16b   : > { %v1276_v39 = vadd.f32 %v1244_v36, %v1164_v50  ;;  %v1277_v32 = vadd.f32 %v1245_v44, %v1165_v48  ;;  %v1570_v22 = vmul.f32 %v3817_v47, %v1524_v27  ;;  %v1571_v49 = vmul.f32 %v3814_v61, %v1524_v27  ;;  %v3859_v36 = vld [vmem:[#allocation25_spill] sm:$0xff] }
 0x16c   : > { %v1572_v16 = vmul.f32 %v3841_v0, %v1524_v27  ;;  %v1573_v25 = vmul.f32 %v3842_v11, %v1524_v27  ;;  %v3372_v20 = vadd.f32 %v1354_v62, %v1274_v17  ;;  %v3374_v51 = vadd.f32 %v1355_v38, %v1275_v10 }
 0x16d   : > { %v3376_v33 = vadd.f32 %v1356_v34, %v1276_v39  ;;  %v3378_v63 = vadd.f32 %v1357_v23, %v1277_v32  ;;  %v1602_v21 = vadd.f32 %v1570_v22, %v3857_v8  ;;  %v1603_v55 = vadd.f32 %v1571_v49, %v3858_v54  ;;  %v3861_v39 = vld [vmem:[#allocation13_spill] sm:$0xff]  ;;  %v3863_v8 = vld [vmem:[#allocation7_spill] sm:$0xff] }
 0x16e   : > { %v1604_v44 = vadd.f32 %v1572_v16, %v3859_v36  ;;  %v1605_v30 = vadd.f32 %v1573_v25, %v3860_v24  ;;  %v1682_v50 = vmul.f32 %v3822_v35, %v1636_v4  ;;  %v1683_v48 = vmul.f32 %v3820_v57, %v1636_v4  ;;  %v1632_v16 = vpop.permute.xlu1 %1631  ;;  %v3862_v25 = vld [vmem:[#allocation23_spill] sm:$0xff] }
 0x16f   : > { %v1684_v27 = vmul.f32 %v3823_v41, %v1636_v4  ;;  %v1685_v10 = vmul.f32 %v3821_v6, %v1636_v4  ;;  %v926_v32 = vmul.f32 %v2835_v3, %v3861_v39  ;;  %v927_v22 = vmul.f32 %v3844_v40, %v3861_v39 }
 0x170   : > { %v928_v62 = vmul.f32 %v2859_v46, %v3861_v39  ;;  %v929_v38 = vmul.f32 %v2945_v28, %v3861_v39  ;;  %v1714_v34 = vadd.f32 %v1682_v50, %v1602_v21  ;;  %v1715_v23 = vadd.f32 %v1683_v48, %v1603_v55  ;;  %v3868_v50 = vld [vmem:[#allocation22_spill] sm:$0xff] }
 0x171   : > { %v1716_v17 = vadd.f32 %v1684_v27, %v1604_v44  ;;  %v1717_v49 = vadd.f32 %v1685_v10, %v1605_v30  ;;  %v1006_v4 = vmul.f32 %v2838_v12, %v3862_v25  ;;  %v1007_v3 = vmul.f32 %v2924_v45, %v3862_v25 }
 0x172   : > { %v1008_v40 = vmul.f32 %v2862_v29, %v3862_v25  ;;  %v1009_v46 = vmul.f32 %v2948_v5, %v3862_v25  ;;  %v3864_v28 = vrot.slane %v2764_v52, %v3863_v8  ;;  %v3865_v54 = vrot.slane %v3827_v9, %v3863_v8 }
 0x173   : > { %v3866_v12 = vrot.slane %v2766_v53, %v3863_v8  ;;  %v3867_v29 = vrot.slane %v3830_v7, %v3863_v8  ;;  %v1038_v5 = vadd.f32 %v1006_v4, %v926_v32  ;;  %v1039_v44 = vadd.f32 %v1007_v3, %v927_v22 }
 0x174   : > { %v3407_v21 = vmul.f32 %v3864_v28, %v1714_v34  ;;  %v3412_v55 = vmul.f32 %v3865_v54, %v1715_v23  ;;  %v1040_v24 = vadd.f32 %v1008_v40, %v928_v62  ;;  %v1041_v30 = vadd.f32 %v1009_v46, %v929_v38  ;;  %v3869_v34 = vld [vmem:[#allocation33_spill] sm:$0xff]  ;;  %v1640_v40 = vpop.permute.xlu0 %1639  ;;  %v3871_v46 = vld [vmem:[#allocation54_spill] sm:$0xff] }
 0x175   : > { %v3417_v45 = vmul.f32 %v3866_v12, %v1716_v17  ;;  %v3422_v36 = vmul.f32 %v3867_v29, %v1717_v49  ;;  %v1118_v48 = vmul.f32 %v2841_v59, %v3868_v50  ;;  %v1119_v27 = vmul.f32 %v2927_v2, %v3868_v50  ;;  %v3870_v49 = vld [vmem:[#allocation34_spill] sm:$0xff]  ;;  %v3872_v29 = vld [vmem:[#allocation47_spill] sm:$0xff] }
 0x176   : > { %v1120_v10 = vmul.f32 %v2865_v31, %v3868_v50  ;;  %v1121_v39 = vmul.f32 %v2951_v43, %v3868_v50  ;;  %v1230_v23 = vmul.f32 %v2844_v15, %v3869_v34  ;;  %v1231_v32 = vmul.f32 %v2930_v19, %v3869_v34  ;;  %v1420_v31 = vpop.permute.xlu1 %1419 }
 0x177   : > { %v1232_v22 = vmul.f32 %v2868_v13, %v3869_v34  ;;  %v1233_v59 = vmul.f32 %v2954_v37, %v3869_v34  ;;  %v1150_v62 = vadd.f32 %v1118_v48, %v1038_v5  ;;  %v1151_v2 = vadd.f32 %v1119_v27, %v1039_v44 }
 0x178   : > { %v1152_v38 = vadd.f32 %v1120_v10, %v1040_v24  ;;  %v1153_v17 = vadd.f32 %v1121_v39, %v1041_v30  ;;  %v1342_v43 = vmul.f32 %v2847_v58, %v3870_v49  ;;  %v1343_v15 = vmul.f32 %v2933_v60, %v3870_v49 }
 0x179   : > { %v1344_v19 = vmul.f32 %v2873_v42, %v3870_v49  ;;  %v1345_v13 = vmul.f32 %v2957_v56, %v3870_v49  ;;  %v1262_v25 = vadd.f32 %v1230_v23, %v1150_v62  ;;  %v1263_v4 = vadd.f32 %v1231_v32, %v1151_v2 }
 0x17a   : > { %v1264_v37 = vadd.f32 %v1232_v22, %v1152_v38  ;;  %v1265_v3 = vadd.f32 %v1233_v59, %v1153_v17  ;;  %v1454_v8 = vmul.f32 %v2850_v1, %v3871_v46  ;;  %v1455_v58 = vmul.f32 %v2936_v26, %v3871_v46  ;;  %v1528_v39 = vpop.permute.xlu1 %1527  ;;  %v1644_v17 = vpop.permute.xlu0 %1643 }
 0x17b   : > { %v1456_v60 = vmul.f32 %v2876_v14, %v3871_v46  ;;  %v1457_v42 = vmul.f32 %v2960_v18, %v3871_v46  ;;  %v1374_v28 = vadd.f32 %v1342_v43, %v1262_v25  ;;  %v1375_v54 = vadd.f32 %v1343_v15, %v1263_v4 }
 0x17c   : > { %v1376_v56 = vadd.f32 %v1344_v19, %v1264_v37  ;;  %v1377_v12 = vadd.f32 %v1345_v13, %v1265_v3  ;;  %v1566_v5 = vmul.f32 %v3817_v47, %v3872_v29  ;;  %v1567_v44 = vmul.f32 %v3814_v61, %v3872_v29 }
 0x17d   : > { %v1568_v24 = vmul.f32 %v3841_v0, %v3872_v29  ;;  %v1569_v30 = vmul.f32 %v3842_v11, %v3872_v29  ;;  %v1486_v50 = vadd.f32 %v1454_v8, %v1374_v28  ;;  %v1487_v48 = vadd.f32 %v1455_v58, %v1375_v54  ;;  %v3873_v58 = vld [vmem:[#allocation44_spill] sm:$0xff] }
 0x17e   : > { %v1488_v27 = vadd.f32 %v1456_v60, %v1376_v56  ;;  %v1489_v10 = vadd.f32 %v1457_v42, %v1377_v12  ;;  %v1678_v34 = vmul.f32 %v3822_v35, %v1632_v16  ;;  %v1679_v23 = vmul.f32 %v3820_v57, %v1632_v16 }
 0x17f   : > { %v1680_v32 = vmul.f32 %v3823_v41, %v1632_v16  ;;  %v1681_v22 = vmul.f32 %v3821_v6, %v1632_v16  ;;  %v1598_v59 = vadd.f32 %v1566_v5, %v1486_v50  ;;  %v1599_v62 = vadd.f32 %v1567_v44, %v1487_v48  ;;  %v1424_v5 = vpop.permute.xlu1 %1423  ;;  %v3878_v48 = vld [vmem:[#allocation14_spill] sm:$0xff] }
 0x180   : > { %v1600_v2 = vadd.f32 %v1568_v24, %v1488_v27  ;;  %v1601_v38 = vadd.f32 %v1569_v30, %v1489_v10  ;;  %v1686_v49 = vmul.f32 %v3822_v35, %v1640_v40  ;;  %v1687_v43 = vmul.f32 %v3820_v57, %v1640_v40  ;;  %v3879_v10 = vld [vmem:[#allocation21_spill] sm:$0xff] }
 0x181   : > { %v1688_v15 = vmul.f32 %v3823_v41, %v1640_v40  ;;  %v1689_v19 = vmul.f32 %v3821_v6, %v1640_v40  ;;  %v1710_v13 = vadd.f32 %v1678_v34, %v1598_v59  ;;  %v1711_v25 = vadd.f32 %v1679_v23, %v1599_v62  ;;  %v3880_v23 = vld [vmem:[#allocation19_spill] sm:$0xff] }
 0x182   : > { %v1712_v4 = vadd.f32 %v1680_v32, %v1600_v2  ;;  %v1713_v37 = vadd.f32 %v1681_v22, %v1601_v38  ;;  %v3473_v3 = vmul.f32 %v3822_v35, %v1644_v17  ;;  %v3476_v16 = vmul.f32 %v3820_v57, %v1644_v17  ;;  %v3881_v22 = vld [vmem:[#allocation31_spill] sm:$0xff] }
 0x183   : > { %v3479_v46 = vmul.f32 %v3823_v41, %v1644_v17  ;;  %v3482_v8 = vmul.f32 %v3821_v6, %v1644_v17  ;;  %v3874_v60 = vrot.slane %v2764_v52, %v3873_v58  ;;  %v3875_v42 = vrot.slane %v3827_v9, %v3873_v58 }
 0x184   : > { %v3876_v54 = vrot.slane %v2766_v53, %v3873_v58  ;;  %v3877_v12 = vrot.slane %v3830_v7, %v3873_v58  ;;  %v1466_v44 = vmul.f32 %v2850_v1, %v1420_v31  ;;  %v1467_v24 = vmul.f32 %v2936_v26, %v1420_v31  ;;  %v1532_v58 = vpop.permute.xlu1 %1531 }
 0x185   : > { %v1814_v40 = vmul.f32 %v3874_v60, %v1710_v13  ;;  %v1815_v28 = vmul.f32 %v3875_v42, %v1711_v25  ;;  %v1468_v30 = vmul.f32 %v2876_v14, %v1420_v31  ;;  %v1469_v50 = vmul.f32 %v2960_v18, %v1420_v31  ;;  %v3883_v60 = vld [vmem:[#allocation61_spill] sm:$0xff]  ;;  %v3884_v42 = vld [vmem:[#allocation62_spill] sm:$0xff] }
 0x186   : > { %v1816_v56 = vmul.f32 %v3876_v54, %v1712_v4  ;;  %v1817_v29 = vmul.f32 %v3877_v12, %v1713_v37  ;;  %v1498_v62 = vadd.f32 %v1466_v44, %v3372_v20  ;;  %v1499_v2 = vadd.f32 %v1467_v24, %v3374_v51  ;;  %v3882_v37 = vld [vmem:[#allocation60_spill] sm:$0xff]  ;;  %v3885_v54 = vld [vmem:[#allocation63_spill] sm:$0xff]  ;;  %v3887_v44 = vld [vmem:[#allocation9_spill] sm:$0xff] }
 0x187   : > { %v1818_v27 = vadd.f32 %v1814_v40, %v3878_v48  ;;  %v1819_v34 = vadd.f32 %v1815_v28, %v3879_v10  ;;  %v1500_v38 = vadd.f32 %v1468_v30, %v3376_v33  ;;  %v1501_v17 = vadd.f32 %v1469_v50, %v3378_v63  ;;  %v3886_v12 = vld [vmem:[#allocation64_spill] sm:$0xff] }
 0x188   : > { %v1820_v32 = vadd.f32 %v1816_v56, %v3880_v23  ;;  %v1821_v59 = vadd.f32 %v1817_v29, %v3881_v22  ;;  %v1462_v20 = vmul.f32 %v2850_v1, %v3882_v37  ;;  %v1463_v51 = vmul.f32 %v2936_v26, %v3882_v37 }
 0x189   : > { %v3509_v13 = vadd.f32 %v3407_v21, %v1818_v27  ;;  %v3512_v31 = vadd.f32 %v3412_v55, %v1819_v34  ;;  %v1464_v33 = vmul.f32 %v2876_v14, %v3882_v37  ;;  %v1465_v63 = vmul.f32 %v2960_v18, %v3882_v37 }
 0x18a   : > { %v3515_v25 = vadd.f32 %v3417_v45, %v1820_v32  ;;  %v3518_v4 = vadd.f32 %v3422_v36, %v1821_v59  ;;  %v1574_v21 = vmul.f32 %v3817_v47, %v1528_v39  ;;  %v1575_v55 = vmul.f32 %v3814_v61, %v1528_v39 }
 0x18b   : > { %v1576_v45 = vmul.f32 %v3841_v0, %v1528_v39  ;;  %v1577_v36 = vmul.f32 %v3842_v11, %v1528_v39  ;;  %v1494_v40 = vadd.f32 %v1462_v20, %v3883_v60  ;;  %v1495_v28 = vadd.f32 %v1463_v51, %v3884_v42  ;;  %v3889_v42 = vld [vmem:[#allocation66_spill] sm:$0xff] }
 0x18c   : > { %v1496_v56 = vadd.f32 %v1464_v33, %v3885_v54  ;;  %v1497_v29 = vadd.f32 %v1465_v63, %v3886_v12  ;;  %v1849_v24 = vrot.slane %v2764_v52, %v3887_v44  ;;  %v1853_v30 = vrot.slane %v3827_v9, %v3887_v44  ;;  %v3888_v63 = vld [vmem:[#allocation65_spill] sm:$0xff] }
 0x18d   : > { %v1857_v50 = vrot.slane %v2766_v53, %v3887_v44  ;;  %v1861_v39 = vrot.slane %v3830_v7, %v3887_v44  ;;  %v1606_v48 = vadd.f32 %v1574_v21, %v1494_v40  ;;  %v1607_v27 = vadd.f32 %v1575_v55, %v1495_v28  ;;  %v3890_v21 = vld [vmem:[#allocation67_spill] sm:$0xff]  ;;  %v1536_v40 = vpop.permute.xlu1 %1535 }
 0x18e   : > { %v1608_v10 = vadd.f32 %v1576_v45, %v1496_v56  ;;  %v1609_v34 = vadd.f32 %v1577_v36, %v1497_v29  ;;  %v1470_v23 = vmul.f32 %v2850_v1, %v1424_v5  ;;  %v1471_v32 = vmul.f32 %v2936_v26, %v1424_v5  ;;  %v3891_v45 = vld [vmem:[#allocation68_spill] sm:$0xff] }
 0x18f   : > { %v1472_v22 = vmul.f32 %v2876_v14, %v1424_v5  ;;  %v1473_v59 = vmul.f32 %v2960_v18, %v1424_v5  ;;  %v1718_v37 = vadd.f32 %v1686_v49, %v1606_v48  ;;  %v1719_v20 = vadd.f32 %v1687_v43, %v1607_v27 }
 0x190   : > { %v1720_v51 = vadd.f32 %v1688_v15, %v1608_v10  ;;  %v1721_v33 = vadd.f32 %v1689_v19, %v1609_v34  ;;  %v1502_v60 = vadd.f32 %v1470_v23, %v3888_v63  ;;  %v1503_v54 = vadd.f32 %v1471_v32, %v3889_v42  ;;  %v3892_v15 = vld [vmem:[#allocation11_spill] sm:$0xff] }
 0x191   : > { %v1504_v55 = vadd.f32 %v1472_v22, %v3890_v21  ;;  %v1505_v36 = vadd.f32 %v1473_v59, %v3891_v45  ;;  %v1862_v1 = vmul.f32 %v1849_v24, %v1718_v37  ;;  %v1863_v28 = vmul.f32 %v1853_v30, %v1719_v20 }
 0x192   : > { %v1864_v26 = vmul.f32 %v1857_v50, %v1720_v51  ;;  %v1865_v56 = vmul.f32 %v1861_v39, %v1721_v33  ;;  %v1578_v14 = vmul.f32 %v3817_v47, %v1532_v58  ;;  %v1579_v18 = vmul.f32 %v3814_v61, %v1532_v58 }
 0x193   : > { %v1580_v49 = vmul.f32 %v3841_v0, %v1532_v58  ;;  %v1581_v43 = vmul.f32 %v3842_v11, %v1532_v58  ;;  %v1873_v19 = vrot.slane %v2764_v52, %v3892_v15  ;;  %v1877_v5 = vrot.slane %v3827_v9, %v3892_v15 }
 0x194   : > { %v1881_v12 = vrot.slane %v2766_v53, %v3892_v15  ;;  %v1885_v29 = vrot.slane %v3830_v7, %v3892_v15  ;;  %v1610_v44 = vadd.f32 %v1578_v14, %v1498_v62  ;;  %v1611_v24 = vadd.f32 %v1579_v18, %v1499_v2  ;;  %v1648_v62 = vpop.permute.xlu1 %1647  ;;  %v3894_v14 = vld [vmem:[#allocation41_spill] sm:$0xff]  ;;  %v3897_v15 = vld [vmem:[#allocation46_spill] sm:$0xff] }
 0x195   : > { %v1612_v30 = vadd.f32 %v1580_v49, %v1500_v38  ;;  %v1613_v50 = vadd.f32 %v1581_v43, %v1501_v17  ;;  %v1582_v39 = vmul.f32 %v3817_v47, %v1536_v40  ;;  %v1583_v58 = vmul.f32 %v3814_v61, %v1536_v40  ;;  %v3896_v43 = vld [vmem:[#allocation42_spill] sm:$0xff] }
 0x196   : > { %v1584_v48 = vmul.f32 %v3841_v0, %v1536_v40  ;;  %v1585_v27 = vmul.f32 %v3842_v11, %v1536_v40  ;;  %v1722_v10 = vadd.f32 %v3473_v3, %v1610_v44  ;;  %v1723_v34 = vadd.f32 %v3476_v16, %v1611_v24 }
 0x197   : > { %v1724_v23 = vadd.f32 %v3479_v46, %v1612_v30  ;;  %v1725_v32 = vadd.f32 %v3482_v8, %v1613_v50  ;;  %v1614_v2 = vadd.f32 %v1582_v39, %v1502_v60  ;;  %v1615_v38 = vadd.f32 %v1583_v58, %v1503_v54 }
 0x198   : > { %v1616_v17 = vadd.f32 %v1584_v48, %v1504_v55  ;;  %v1617_v22 = vadd.f32 %v1585_v27, %v1505_v36  ;;  %v1886_v47 = vmul.f32 %v1873_v19, %v1722_v10  ;;  %v1887_v59 = vmul.f32 %v1877_v5, %v1723_v34  ;;  %v3893_v55 = vld [vmem:[#allocation45_spill] sm:$0xff] }
 0x199   : > { %v1888_v61 = vmul.f32 %v1881_v12, %v1724_v23  ;;  %v1889_v37 = vmul.f32 %v1885_v29, %v1725_v32  ;;  %v1694_v0 = vmul.f32 %v3822_v35, %v1648_v62  ;;  %v1695_v11 = vmul.f32 %v3820_v57, %v1648_v62 }
 0x19a   : > { %v1696_v3 = vmul.f32 %v3823_v41, %v1648_v62  ;;  %v1697_v16 = vmul.f32 %v3821_v6, %v1648_v62  ;;  %v1866_v46 = vadd.f32 %v1862_v1, %v3509_v13  ;;  %v1867_v8 = vadd.f32 %v1863_v28, %v3512_v31 }
 0x19b   : > { %v1868_v20 = vadd.f32 %v1864_v26, %v3515_v25  ;;  %v1869_v51 = vadd.f32 %v1865_v56, %v3518_v4  ;;  %v1726_v33 = vadd.f32 %v1694_v0, %v1614_v2  ;;  %v1727_v63 = vadd.f32 %v1695_v11, %v1615_v38 }
 0x19c   : > { %v1728_v60 = vadd.f32 %v1696_v3, %v1616_v17  ;;  %v1729_v42 = vadd.f32 %v1697_v16, %v1617_v22  ;;  %v1890_v54 = vadd.f32 %v1886_v47, %v1866_v46  ;;  %v1891_v35 = vadd.f32 %v1887_v59, %v1867_v8 }
 0x19d   : > { %v1892_v21 = vadd.f32 %v1888_v61, %v1868_v20  ;;  %v1893_v57 = vadd.f32 %v1889_v37, %v1869_v51  ;;  %v1897_v41 = vrot.slane %v2764_v52, %v3893_v55  ;;  %v1901_v6 = vrot.slane %v3827_v9, %v3893_v55  ;;  %v3895_v9 = vld [vmem:[#allocation43_spill] sm:$0xff] }
 0x19e   : > { %v1905_v13 = vrot.slane %v2766_v53, %v3893_v55  ;;  %v1909_v31 = vrot.slane %v3830_v7, %v3893_v55  ;;  %v2350_v40 = vmov 1966171168  }
 0x19f   : > { %v1910_v25 = vmul.f32 %v1897_v41, %v1726_v33  ;;  %v1911_v4 = vmul.f32 %v1901_v6, %v1727_v63  ;;  %v3588_v1 = vunpack.c.l.s4 %v2350_v40 }
 0x1a0   : > { %v1912_v45 = vmul.f32 %v1905_v13, %v1728_v60  ;;  %v1913_v36 = vmul.f32 %v1909_v31, %v1729_v42 }
 0x1a1   : > { %v1914_v28 = vadd.f32 %v1910_v25, %v1890_v54  ;;  %v1915_v26 = vadd.f32 %v1911_v4, %v1891_v35  ;;  %v2018_v7 = vunpack.c.0.s8 %v3588_v1 }
 0x1a2   : > { %v1916_v56 = vadd.f32 %v1912_v45, %v1892_v21  ;;  %v1917_v52 = vadd.f32 %v1913_v36, %v1893_v57 }
 0x1a3   : > { %v1918_v18 = vmul.f32 %v1914_v28, %v3894_v14  ;;  %v1919_v49 = vmul.f32 %v1915_v26, %v3895_v9  ;;  %v3898_v26 = vld [vmem:[#allocation5_spill] sm:$0xff] }
 0x1a4   : > { %v1920_v53 = vmul.f32 %v1916_v56, %v3896_v43  ;;  %v1921_v19 = vmul.f32 %v1917_v52, %v3897_v15  ;;  %v2021_v56 = vsub.s32 %v2018_v7, %v3898_v26 }
 0x1a5   : > { %v1926_v5 = vrot.slane %v1918_v18, 1  ;;  %v1927_v12 = vrot.slane %v1919_v49, 1  ;;  %v1938_v24 = vrot.slane %v1918_v18, 2  ;;  %v1939_v30 = vrot.slane %v1919_v49, 2 }
 0x1a6   : > { %v1928_v29 = vrot.slane %v1920_v53, 1  ;;  %v1929_v44 = vrot.slane %v1921_v19, 1  ;;  %v1940_v50 = vrot.slane %v1920_v53, 2  ;;  %v1941_v39 = vrot.slane %v1921_v19, 2 }
 0x1a7   : > { %v1934_v58 = vadd.f32 %v1926_v5, %v1918_v18  ;;  %v1935_v48 = vadd.f32 %v1927_v12, %v1919_v49  ;;  %v1950_v34 = vrot.slane %v1918_v18, 3  ;;  %v1951_v23 = vrot.slane %v1919_v49, 3 }
 0x1a8   : > { %v1936_v27 = vadd.f32 %v1928_v29, %v1920_v53  ;;  %v1937_v10 = vadd.f32 %v1929_v44, %v1921_v19  ;;  %v1952_v32 = vrot.slane %v1920_v53, 3  ;;  %v1953_v62 = vrot.slane %v1921_v19, 3 }
 0x1a9   : > { %v1946_v2 = vadd.f32 %v1938_v24, %v1934_v58  ;;  %v1947_v38 = vadd.f32 %v1939_v30, %v1935_v48  ;;  %v1962_v47 = vrot.slane %v1918_v18, 4  ;;  %v1963_v59 = vrot.slane %v1919_v49, 4 }
 0x1aa   : > { %v1948_v17 = vadd.f32 %v1940_v50, %v1936_v27  ;;  %v1949_v22 = vadd.f32 %v1941_v39, %v1937_v10  ;;  %v1964_v61 = vrot.slane %v1920_v53, 4  ;;  %v1965_v37 = vrot.slane %v1921_v19, 4 }
 0x1ab   : > { %v1958_v0 = vadd.f32 %v1950_v34, %v1946_v2  ;;  %v1959_v11 = vadd.f32 %v1951_v23, %v1947_v38  ;;  %v1974_v46 = vrot.slane %v1918_v18, 5  ;;  %v1975_v8 = vrot.slane %v1919_v49, 5 }
 0x1ac   : > { %v1960_v3 = vadd.f32 %v1952_v32, %v1948_v17  ;;  %v1961_v16 = vadd.f32 %v1953_v62, %v1949_v22  ;;  %v1976_v20 = vrot.slane %v1920_v53, 5  ;;  %v1977_v51 = vrot.slane %v1921_v19, 5 }
 0x1ad   : > { %v1970_v33 = vadd.f32 %v1962_v47, %v1958_v0  ;;  %v1971_v63 = vadd.f32 %v1963_v59, %v1959_v11  ;;  %v1986_v54 = vrot.slane %v1918_v18, 6  ;;  %v1987_v35 = vrot.slane %v1919_v49, 6 }
 0x1ae   : > { %v1972_v60 = vadd.f32 %v1964_v61, %v1960_v3  ;;  %v1973_v42 = vadd.f32 %v1965_v37, %v1961_v16  ;;  %v1988_v21 = vrot.slane %v1920_v53, 6  ;;  %v1989_v57 = vrot.slane %v1921_v19, 6 }
 0x1af   : > { %v1982_v55 = vadd.f32 %v1974_v46, %v1970_v33  ;;  %v1983_v41 = vadd.f32 %v1975_v8, %v1971_v63  ;;  %v1998_v31 = vrot.slane %v1918_v18, 7  ;;  %v1999_v25 = vrot.slane %v1919_v49, 7 }
 0x1b0   : > { %v1984_v6 = vadd.f32 %v1976_v20, %v1972_v60  ;;  %v1985_v13 = vadd.f32 %v1977_v51, %v1973_v42  ;;  %v2000_v4 = vrot.slane %v1920_v53, 7  ;;  %v2001_v45 = vrot.slane %v1921_v19, 7 }
 0x1b1   : > { %v1994_v36 = vadd.f32 %v1986_v54, %v1982_v55  ;;  %v1995_v40 = vadd.f32 %v1987_v35, %v1983_v41  ;;  %v3899_v5 = vlaneseq }
 0x1b2   : > { %v1996_v1 = vadd.f32 %v1988_v21, %v1984_v6  ;;  %v1997_v28 = vadd.f32 %v1989_v57, %v1985_v13 }
 0x1b3   : > { %v2006_v52 = vadd.f32 %v1998_v31, %v1994_v36  ;;  %v2007_v14 = vadd.f32 %v1999_v25, %v1995_v40  ;;  %vm2041_vm0 = vcmp.lt.s32.totalorder %v3899_v5, 512 }
 0x1b4   : > { %v2008_v9 = vadd.f32 %v2000_v4, %v1996_v1  ;;  %v2009_v43 = vadd.f32 %v2001_v45, %v1997_v28 }
 0x1b5   : > { %v2014_v15 = vcombine.low %v2006_v52, %v2007_v14 }
 0x1b6   : > { %v2015_v18 = vcombine.low %v2008_v9, %v2009_v43 }
 0x1b7   : > { %v2022_v49 = vrot.slane %v2014_v15, %v2021_v56 }
 0x1b8   : > { %v2029_v53 = vrot.slane %v2015_v18, %v2021_v56 }
 0x1ba   : > { %v2030_v19 = vcombine.low %v2022_v49, %v2029_v53 }
 0x1bc   : > { %v2037_v12 = vrot.slane %v2030_v19, %v2021_v56 }
 0x1be   : > { %2043 = vst.msk [vmem:[%s218_s25] sm:$0xf] %vm2041_vm0, %v2037_v12 }
 0x1bf   : > { %2288 = shalt.err (!%p2285_p3)
}
 0x1c0   : > { %s2289_s12 = scalar_lea.hbm %s3604_s7, 64  ;;  %s2293_s15 = scalar_lea.hbm %s3653_s5, 128 }
 0x1c1   : > { %p2290_p4 = scmp.ne.s32.totalorder %s3604_s7, %s2289_s12  ;;  %p2294_p9 = scmp.lt.u32.totalorder %s3604_s7, %s3653_s5 }
 0x1c2   : > { %p2295_p10 = scmp.lt.u32.totalorder %s2293_s15, %s2289_s12  ;;  %p2297_p12 = scmp.lt.u32.totalorder %s2289_s12, %s3604_s7 }
 0x1c3   : > { %p2291_p7 = pnand %p2290_p4, %p2420_p5 }
 0x1c4   : > { %p2296_p11 = por %p2295_p10, %p2294_p9 }
 0x1c5   : > { %p2292_p8 = pneg %p2291_p7 }
 0x1c6   : > { %p2298_p13 = por %p2297_p12, %p2296_p11 }
 0x1c8   : > { %p2299_p0 = pnand %p2298_p13, %p2292_p8 }
 0x1ca   : > { %2302 = shalt.err (!%p2299_p0)
}
 0x1cb   : > { %2193 = dma.vmem_to_hbm [thread:$0]  (%p2420_p5), %s3606_s26, 64, %s3604_s7, %s2045_s8  }
 0x1cc PF: > { %p2199_p1 = scmp.ge.s32.totalorder %s2337_s21, 2  ;;  %s2071_s23 = sand.u32 1, %s2325_s18  }
 0x1cd   : > { %s2072_s25 = scalar_lea.sflag [#allocation3], %s2071_s23 }
 0x1ce   : > { %p2196_p2 = pnand %p2199_p1, %p2424_p6 }
 0x1d0   : > { %2320 = dma.done.wait (!%p2196_p2), %s2072_s25, 64  }
 0x1d1   : > { %2322 = vsyncadd (!%p2196_p2), %s2072_s25, 4294967232  ;;  %p15_p3 = scmp.ge.s32.totalorder %s2407_s24, 4   ;;  %s3900_s18 = smov %s2329_s19 }
 0x1d2   : > { %s3901_s19 = smov %s2333_s20  ;;  %s3902_s20 = smov %s2418_s27 }
 0x1d3   : > { %s3903_s21 = smov %s2407_s24  ;;  %17 = sbr.rel (!%p15_p3) target bundleno = 3 (0x3), region = 75 }
 0x1da   :  { %2077 = vsyncpa [#allocation3], 1 }
 0x1db   :  { %2079 = vsyncpa [#allocation3 + $0x1], 1 }

</bundles_post_ra>
